<compile_context>
chip_gen: v6e
topology: v6e:2x2x1
jax: 0.10.0
libtpu: 0.0.40
codegen_flags: <defaults>
</compile_context>

<pallas_src>
import jax
import jax.numpy as jnp
from jax.experimental import pallas as pl
from jax.experimental.pallas import tpu as pltpu


def _make_cost_volume_kernel(shifts, pad, cg, ht, w):
    wp = w + 2 * pad
    scale = 1.0 / (3.0 * cg)   # folds the /3 of the variance with the group mean
    scale3 = scale / 3.0       # coefficient of the squared-sum term

    def kernel(ref_ref, ls_ref, rs_ref, out_ref, lsp_ref, rsp_ref, sl_ref, sr_ref):
        # ref_ref: (1, cg, ht, w)    reference features (one batch, group, H tile)
        # ls_ref : (1, cg, ht, w)    left-view features
        # rs_ref : (1, cg, ht, w)    right-view features
        # out_ref: (1, 1, D, ht, w)  group-mean variance cost
        # lsp_ref / rsp_ref: (cg, ht, wp)  zero-halo padded copies (VMEM scratch)
        # sl_ref  / sr_ref : (ht, wp)      channel-reduced squared maps (scratch)

        # ---- once per grid step: padded copies + shift-invariant reductions ----
        if pad > 0:
            halo = jnp.zeros((cg, ht, pad), jnp.float32)
            lsp_ref[:, :, 0:pad] = halo
            lsp_ref[:, :, pad + w:wp] = halo
            rsp_ref[:, :, 0:pad] = halo
            rsp_ref[:, :, pad + w:wp] = halo
        lsp_ref[:, :, pad:pad + w] = ls_ref[0]
        rsp_ref[:, :, pad:pad + w] = rs_ref[0]

        lsp = lsp_ref[...]
        rsp = rsp_ref[...]
        ref = ref_ref[0]                                 # (cg, ht, w)
        sl_ref[...] = jnp.sum(lsp * lsp, axis=0)         # sum_c ls^2  (ht, wp)
        sr_ref[...] = jnp.sum(rsp * rsp, axis=0)         # sum_c rs^2  (ht, wp)
        sref = jnp.sum(ref * ref, axis=0)                # sum_c ref^2 (ht, w)

        # ---- per disparity: only (wl + wr + ref)^2 needs per-channel work ----
        for d, s in enumerate(shifts):
            ol = pad + s        # lane offset realizing warp_left  (ls shifted by +s)
            orr = pad - s       # lane offset realizing warp_right (rs shifted by -s)
            wl = lsp_ref[:, :, ol:ol + w]
            wr = rsp_ref[:, :, orr:orr + w]
            s3 = wl + wr + ref
            t = jnp.sum(s3 * s3, axis=0)                                  # (ht, w)
            sq = sl_ref[:, ol:ol + w] + sr_ref[:, orr:orr + w] + sref     # (ht, w)
            out_ref[0, 0, d] = sq * scale - t * scale3

    return kernel


def _choose_h_tile(H, W, D, cg, pad, target_bytes=8 * 1024 * 1024):
    """Largest H tile (multiple of 8 dividing H) whose per-step VMEM footprint
    (double-buffered I/O blocks + scratch) stays under target_bytes."""
    cands = [h for h in range(8, H + 1, 8) if H % h == 0]
    if not cands:
        return H
    wp = W + 2 * pad

    def step_bytes(ht):
        io = (3 * cg * ht * W + D * ht * W) * 4 * 2       # double-buffered blocks
        scr = (2 * cg * ht * wp + 2 * ht * wp) * 4        # padded copies + reduced maps
        return io + scr

    fit = [h for h in cands if step_bytes(h) <= target_bytes]
    return max(fit) if fit else min(cands)


def cost_volume_s1(feat_ref, feat_ls, feat_rs, disp_sample, group_num, h_tile=None):
    """feat_*: (B, C, H, W); disp_sample: static sequence of integer disparities."""
    B, C, H, W = feat_ref.shape
    assert C % group_num == 0
    cg = C // group_num
    shifts = tuple(int(d) for d in disp_sample)
    D = len(shifts)
    assert D > 0
    pad = max((abs(s) for s in shifts), default=0)
    wp = W + 2 * pad

    if h_tile is None:
        ht = _choose_h_tile(H, W, D, cg, pad)
    else:
        ht = int(h_tile)
    assert H % ht == 0 and (ht % 8 == 0 or ht == H)

    f32 = jnp.float32
    fr = feat_ref.astype(f32)
    fl = feat_ls.astype(f32)
    fs = feat_rs.astype(f32)

    kernel = _make_cost_volume_kernel(shifts, pad, cg, ht, W)

    grid = (B, group_num, H // ht)
    in_spec = pl.BlockSpec((1, cg, ht, W), lambda b, g, h: (b, g, h, 0))
    out_spec = pl.BlockSpec((1, 1, D, ht, W), lambda b, g, h: (b, g, 0, h, 0))

    scratch = [
        pltpu.VMEM((cg, ht, wp), f32),   # zero-halo padded left features
        pltpu.VMEM((cg, ht, wp), f32),   # zero-halo padded right features
        pltpu.VMEM((ht, wp), f32),       # sum_c ls^2
        pltpu.VMEM((ht, wp), f32),       # sum_c rs^2
    ]

    # Per-step VMEM bookkeeping; only raise the scoped limit if really needed.
    step_bytes = ((3 * cg * ht * W + D * ht * W) * 4 * 2
                  + (2 * cg * ht * wp + 2 * ht * wp) * 4)
    params = dict(dimension_semantics=("parallel", "parallel", "parallel"))
    if step_bytes > 12 * 1024 * 1024:
        params["vmem_limit_bytes"] = min(int(step_bytes * 2), 100 * 1024 * 1024)

    return pl.pallas_call(
        kernel,
        out_shape=jax.ShapeDtypeStruct((B, group_num, D, H, W), f32),
        grid=grid,
        in_specs=[in_spec, in_spec, in_spec],
        out_specs=out_spec,
        scratch_shapes=scratch,
        compiler_params=pltpu.CompilerParams(**params),
    )(fr, fl, fs)


# ---------------------------------------------------------------------------
# Pure-JAX reference (mirrors the PyTorch module with the assumed Warp).
# ---------------------------------------------------------------------------
def _hshift(x, s):
    """out[..., w] = x[..., w + s], zeros outside (grid_sample zero padding)."""
    if s == 0:
        return x
    zeros = jnp.zeros(x.shape[:-1] + (abs(s),), x.dtype)
    if s > 0:
        return jnp.concatenate([x[..., s:], zeros], axis=-1)
    return jnp.concatenate([zeros, x[..., :s]], axis=-1)


def cost_volume_s1_ref(feat_ref, feat_ls, feat_rs, disp_sample, group_num):
    B, C, H, W = feat_ref.shape
    slabs = []
    for i in disp_sample:
        i = int(i)
        if i != 0:
            wl = _hshift(feat_ls, +i)     # Warp(feat_ls, disp=i, x_dist=+1)
            wr = _hshift(feat_rs, -i)     # Warp(feat_rs, disp=i, x_dist=-1)
        else:
            wl, wr = feat_ls, feat_rs
        mu = (wl + wr + feat_ref) / 3.0
        var = ((wl - mu) ** 2 + (wr - mu) ** 2 + (feat_ref - mu) ** 2) / 3.0
        slabs.append(var)
    cost = jnp.stack(slabs, axis=2)                      # (B, C, D, H, W)
    cg = C // group_num
    cost = cost.reshape(B, group_num, cg, len(disp_sample), H, W).mean(axis=2)
    return cost


if __name__ == "__main__":
    key = jax.random.PRNGKey(0)

    def run_case(B, C, H, W, group_num, disp_sample, k, h_tile=None):
        kr, kl, ks = jax.random.split(k, 3)
        fr = jax.random.normal(kr, (B, C, H, W), dtype=jnp.float32)
        fl = jax.random.normal(kl, (B, C, H, W), dtype=jnp.float32)
        fs = jax.random.normal(ks, (B, C, H, W), dtype=jnp.float32)

        out = cost_volume_s1(fr, fl, fs, disp_sample, group_num, h_tile=h_tile)
        out = jax.block_until_ready(out)
        ref = cost_volume_s1_ref(fr, fl, fs, disp_sample, group_num)

        assert out.shape == (B, group_num, len(disp_sample), H, W), out.shape
        err = float(jnp.max(jnp.abs(out - ref)))
        assert err < 1e-4, err

    k1, k2 = jax.random.split(key)
    # Case 1: module-consistent small shapes (single H tile, contiguous disparities).
    run_case(2, 4, 16, 16, 2, list(range(8)), k=k1)
    # Case 2: multi-tile H grid, non-uniform + negative disparities.
    run_case(1, 8, 32, 16, 4, [-2, 0, 1, 3, 5], k=k2, h_tile=8)

    print("KERNEL_OK")
</pallas_src>

<mosaic_0001>
module attributes {stable_mosaic.version = 11 : i64} {
  func.func @kernel(%arg0: i32, %arg1: i32, %arg2: i32, %arg3: memref<1x2x16x16xf32, #tpu.memory_space<vmem>>, %arg4: memref<1x2x16x16xf32, #tpu.memory_space<vmem>>, %arg5: memref<1x2x16x16xf32, #tpu.memory_space<vmem>>, %arg6: memref<1x1x8x16x16xf32, #tpu.memory_space<vmem>>, %arg7: memref<2x16x30xf32, #tpu.memory_space<vmem>>, %arg8: memref<2x16x30xf32, #tpu.memory_space<vmem>>, %arg9: memref<16x30xf32, #tpu.memory_space<vmem>>, %arg10: memref<16x30xf32, #tpu.memory_space<vmem>>) attributes {dimension_semantics = [#tpu.dimension_semantics<parallel>, #tpu.dimension_semantics<parallel>, #tpu.dimension_semantics<parallel>], iteration_bounds = array<i64: 2, 2, 1>, scalar_prefetch = 0 : i64, scratch_operands = 4 : i64, tpu.core_type = #tpu.core_type<tc>, window_params = [{transform_indices = @transform_0, window_bounds = array<i64: 1, 2, 16, 16>}, {transform_indices = @transform_1, window_bounds = array<i64: 1, 2, 16, 16>}, {transform_indices = @transform_2, window_bounds = array<i64: 1, 2, 16, 16>}, {transform_indices = @transform_3, window_bounds = array<i64: 1, 1, 8, 16, 16>}]} {
    %cst = arith.constant 0.000000e+00 : f32
    %0 = vector.broadcast %cst : f32 to vector<2x16x7xf32>
    %c0 = arith.constant 0 : index
    %c0_0 = arith.constant 0 : index
    %c0_1 = arith.constant 0 : index
    %1 = vector.load %arg7[%c0, %c0_0, %c0_1] : memref<2x16x30xf32, #tpu.memory_space<vmem>>, vector<2x16x7xf32>
    tpu.vector_store %arg7[%c0, %c0_0, %c0_1], %0 {strides = array<i32>} : memref<2x16x30xf32, #tpu.memory_space<vmem>>, vector<2x16x7xf32>,
    %c0_2 = arith.constant 0 : index
    %c0_3 = arith.constant 0 : index
    %c23 = arith.constant 23 : index
    %2 = vector.load %arg7[%c0_2, %c0_3, %c23] : memref<2x16x30xf32, #tpu.memory_space<vmem>>, vector<2x16x7xf32>
    tpu.vector_store %arg7[%c0_2, %c0_3, %c23], %0 {strides = array<i32>} : memref<2x16x30xf32, #tpu.memory_space<vmem>>, vector<2x16x7xf32>,
    %c0_4 = arith.constant 0 : index
    %c0_5 = arith.constant 0 : index
    %c0_6 = arith.constant 0 : index
    %3 = vector.load %arg8[%c0_4, %c0_5, %c0_6] : memref<2x16x30xf32, #tpu.memory_space<vmem>>, vector<2x16x7xf32>
    tpu.vector_store %arg8[%c0_4, %c0_5, %c0_6], %0 {strides = array<i32>} : memref<2x16x30xf32, #tpu.memory_space<vmem>>, vector<2x16x7xf32>,
    %c0_7 = arith.constant 0 : index
    %c0_8 = arith.constant 0 : index
    %c23_9 = arith.constant 23 : index
    %4 = vector.load %arg8[%c0_7, %c0_8, %c23_9] : memref<2x16x30xf32, #tpu.memory_space<vmem>>, vector<2x16x7xf32>
    tpu.vector_store %arg8[%c0_7, %c0_8, %c23_9], %0 {strides = array<i32>} : memref<2x16x30xf32, #tpu.memory_space<vmem>>, vector<2x16x7xf32>,
    %c0_10 = arith.constant 0 : index
    %c0_11 = arith.constant 0 : index
    %c0_12 = arith.constant 0 : index
    %c0_13 = arith.constant 0 : index
    %5 = vector.load %arg4[%c0_10, %c0_11, %c0_12, %c0_13] : memref<1x2x16x16xf32, #tpu.memory_space<vmem>>, vector<1x2x16x16xf32>
    %6 = vector.shape_cast %5 : vector<1x2x16x16xf32> to vector<2x16x16xf32>
    %c0_14 = arith.constant 0 : index
    %c0_15 = arith.constant 0 : index
    %c7 = arith.constant 7 : index
    %7 = vector.load %arg7[%c0_14, %c0_15, %c7] : memref<2x16x30xf32, #tpu.memory_space<vmem>>, vector<2x16x16xf32>
    tpu.vector_store %arg7[%c0_14, %c0_15, %c7], %6 {strides = array<i32>} : memref<2x16x30xf32, #tpu.memory_space<vmem>>, vector<2x16x16xf32>,
    %c0_16 = arith.constant 0 : index
    %c0_17 = arith.constant 0 : index
    %c0_18 = arith.constant 0 : index
    %c0_19 = arith.constant 0 : index
    %8 = vector.load %arg5[%c0_16, %c0_17, %c0_18, %c0_19] : memref<1x2x16x16xf32, #tpu.memory_space<vmem>>, vector<1x2x16x16xf32>
    %9 = vector.shape_cast %8 : vector<1x2x16x16xf32> to vector<2x16x16xf32>
    %c0_20 = arith.constant 0 : index
    %c0_21 = arith.constant 0 : index
    %c7_22 = arith.constant 7 : index
    %10 = vector.load %arg8[%c0_20, %c0_21, %c7_22] : memref<2x16x30xf32, #tpu.memory_space<vmem>>, vector<2x16x16xf32>
    tpu.vector_store %arg8[%c0_20, %c0_21, %c7_22], %9 {strides = array<i32>} : memref<2x16x30xf32, #tpu.memory_space<vmem>>, vector<2x16x16xf32>,
    %c0_23 = arith.constant 0 : index
    %c0_24 = arith.constant 0 : index
    %c0_25 = arith.constant 0 : index
    %11 = vector.load %arg7[%c0_23, %c0_24, %c0_25] : memref<2x16x30xf32, #tpu.memory_space<vmem>>, vector<2x16x30xf32>
    %c0_26 = arith.constant 0 : index
    %c0_27 = arith.constant 0 : index
    %c0_28 = arith.constant 0 : index
    %12 = vector.load %arg8[%c0_26, %c0_27, %c0_28] : memref<2x16x30xf32, #tpu.memory_space<vmem>>, vector<2x16x30xf32>
    %c0_29 = arith.constant 0 : index
    %c0_30 = arith.constant 0 : index
    %c0_31 = arith.constant 0 : index
    %c0_32 = arith.constant 0 : index
    %13 = vector.load %arg3[%c0_29, %c0_30, %c0_31, %c0_32] : memref<1x2x16x16xf32, #tpu.memory_space<vmem>>, vector<1x2x16x16xf32>
    %14 = vector.shape_cast %13 : vector<1x2x16x16xf32> to vector<2x16x16xf32>
    %15 = arith.mulf %11, %11 : vector<2x16x30xf32>
    %cst_33 = arith.constant dense<0.000000e+00> : vector<16x30xf32>
    %16 = vector.multi_reduction <add>, %15, %cst_33 [0] : vector<2x16x30xf32> to vector<16x30xf32>
    %c0_34 = arith.constant 0 : index
    %c0_35 = arith.constant 0 : index
    %17 = vector.load %arg9[%c0_34, %c0_35] : memref<16x30xf32, #tpu.memory_space<vmem>>, vector<16x30xf32>
    tpu.vector_store %arg9[%c0_34, %c0_35], %16 {strides = array<i32>} : memref<16x30xf32, #tpu.memory_space<vmem>>, vector<16x30xf32>,
    %18 = arith.mulf %12, %12 : vector<2x16x30xf32>
    %cst_36 = arith.constant dense<0.000000e+00> : vector<16x30xf32>
    %19 = vector.multi_reduction <add>, %18, %cst_36 [0] : vector<2x16x30xf32> to vector<16x30xf32>
    %c0_37 = arith.constant 0 : index
    %c0_38 = arith.constant 0 : index
    %20 = vector.load %arg10[%c0_37, %c0_38] : memref<16x30xf32, #tpu.memory_space<vmem>>, vector<16x30xf32>
    tpu.vector_store %arg10[%c0_37, %c0_38], %19 {strides = array<i32>} : memref<16x30xf32, #tpu.memory_space<vmem>>, vector<16x30xf32>,
    %21 = arith.mulf %14, %14 : vector<2x16x16xf32>
    %cst_39 = arith.constant dense<0.000000e+00> : vector<16x16xf32>
    %22 = vector.multi_reduction <add>, %21, %cst_39 [0] : vector<2x16x16xf32> to vector<16x16xf32>
    %c0_40 = arith.constant 0 : index
    %c0_41 = arith.constant 0 : index
    %c7_42 = arith.constant 7 : index
    %23 = vector.load %arg7[%c0_40, %c0_41, %c7_42] : memref<2x16x30xf32, #tpu.memory_space<vmem>>, vector<2x16x16xf32>
    %c0_43 = arith.constant 0 : index
    %c0_44 = arith.constant 0 : index
    %c7_45 = arith.constant 7 : index
    %24 = vector.load %arg8[%c0_43, %c0_44, %c7_45] : memref<2x16x30xf32, #tpu.memory_space<vmem>>, vector<2x16x16xf32>
    %25 = arith.addf %23, %24 : vector<2x16x16xf32>
    %26 = arith.addf %25, %14 : vector<2x16x16xf32>
    %27 = arith.mulf %26, %26 : vector<2x16x16xf32>
    %cst_46 = arith.constant dense<0.000000e+00> : vector<16x16xf32>
    %28 = vector.multi_reduction <add>, %27, %cst_46 [0] : vector<2x16x16xf32> to vector<16x16xf32>
    %c0_47 = arith.constant 0 : index
    %c7_48 = arith.constant 7 : index
    %29 = vector.load %arg9[%c0_47, %c7_48] : memref<16x30xf32, #tpu.memory_space<vmem>>, vector<16x16xf32>
    %c0_49 = arith.constant 0 : index
    %c7_50 = arith.constant 7 : index
    %30 = vector.load %arg10[%c0_49, %c7_50] : memref<16x30xf32, #tpu.memory_space<vmem>>, vector<16x16xf32>
    %31 = arith.addf %29, %30 : vector<16x16xf32>
    %32 = arith.addf %31, %22 : vector<16x16xf32>
    %cst_51 = arith.constant 0.166666672 : f32
    %33 = vector.broadcast %cst_51 : f32 to vector<16x16xf32>
    %34 = arith.mulf %32, %33 : vector<16x16xf32>
    %cst_52 = arith.constant 0.055555556 : f32
    %35 = vector.broadcast %cst_52 : f32 to vector<16x16xf32>
    %36 = arith.mulf %28, %35 : vector<16x16xf32>
    %37 = arith.subf %34, %36 : vector<16x16xf32>
    %c0_53 = arith.constant 0 : index
    %c0_54 = arith.constant 0 : index
    %c0_55 = arith.constant 0 : index
    %c0_56 = arith.constant 0 : index
    %c0_57 = arith.constant 0 : index
    %38 = vector.load %arg6[%c0_53, %c0_54, %c0_55, %c0_56, %c0_57] : memref<1x1x8x16x16xf32, #tpu.memory_space<vmem>>, vector<1x1x1x16x16xf32>
    %39 = vector.shape_cast %38 : vector<1x1x1x16x16xf32> to vector<16x16xf32>
    %40 = vector.shape_cast %37 : vector<16x16xf32> to vector<1x1x1x16x16xf32>
    tpu.vector_store %arg6[%c0_53, %c0_54, %c0_55, %c0_56, %c0_57], %40 {strides = array<i32>} : memref<1x1x8x16x16xf32, #tpu.memory_space<vmem>>, vector<1x1x1x16x16xf32>,
    %c0_58 = arith.constant 0 : index
    %c0_59 = arith.constant 0 : index
    %c8 = arith.constant 8 : index
    %41 = vector.load %arg7[%c0_58, %c0_59, %c8] : memref<2x16x30xf32, #tpu.memory_space<vmem>>, vector<2x16x16xf32>
    %c0_60 = arith.constant 0 : index
    %c0_61 = arith.constant 0 : index
    %c6 = arith.constant 6 : index
    %42 = vector.load %arg8[%c0_60, %c0_61, %c6] : memref<2x16x30xf32, #tpu.memory_space<vmem>>, vector<2x16x16xf32>
    %43 = arith.addf %41, %42 : vector<2x16x16xf32>
    %44 = arith.addf %43, %14 : vector<2x16x16xf32>
    %45 = arith.mulf %44, %44 : vector<2x16x16xf32>
    %cst_62 = arith.constant dense<0.000000e+00> : vector<16x16xf32>
    %46 = vector.multi_reduction <add>, %45, %cst_62 [0] : vector<2x16x16xf32> to vector<16x16xf32>
    %c0_63 = arith.constant 0 : index
    %c8_64 = arith.constant 8 : index
    %47 = vector.load %arg9[%c0_63, %c8_64] : memref<16x30xf32, #tpu.memory_space<vmem>>, vector<16x16xf32>
    %c0_65 = arith.constant 0 : index
    %c6_66 = arith.constant 6 : index
    %48 = vector.load %arg10[%c0_65, %c6_66] : memref<16x30xf32, #tpu.memory_space<vmem>>, vector<16x16xf32>
    %49 = arith.addf %47, %48 : vector<16x16xf32>
    %50 = arith.addf %49, %22 : vector<16x16xf32>
    %cst_67 = arith.constant 0.166666672 : f32
    %51 = vector.broadcast %cst_67 : f32 to vector<16x16xf32>
    %52 = arith.mulf %50, %51 : vector<16x16xf32>
    %cst_68 = arith.constant 0.055555556 : f32
    %53 = vector.broadcast %cst_68 : f32 to vector<16x16xf32>
    %54 = arith.mulf %46, %53 : vector<16x16xf32>
    %55 = arith.subf %52, %54 : vector<16x16xf32>
    %c0_69 = arith.constant 0 : index
    %c0_70 = arith.constant 0 : index
    %c1 = arith.constant 1 : index
    %c0_71 = arith.constant 0 : index
    %c0_72 = arith.constant 0 : index
    %56 = vector.load %arg6[%c0_69, %c0_70, %c1, %c0_71, %c0_72] : memref<1x1x8x16x16xf32, #tpu.memory_space<vmem>>, vector<1x1x1x16x16xf32>
    %57 = vector.shape_cast %56 : vector<1x1x1x16x16xf32> to vector<16x16xf32>
    %58 = vector.shape_cast %55 : vector<16x16xf32> to vector<1x1x1x16x16xf32>
    tpu.vector_store %arg6[%c0_69, %c0_70, %c1, %c0_71, %c0_72], %58 {strides = array<i32>} : memref<1x1x8x16x16xf32, #tpu.memory_space<vmem>>, vector<1x1x1x16x16xf32>,
    %c0_73 = arith.constant 0 : index
    %c0_74 = arith.constant 0 : index
    %c9 = arith.constant 9 : index
    %59 = vector.load %arg7[%c0_73, %c0_74, %c9] : memref<2x16x30xf32, #tpu.memory_space<vmem>>, vector<2x16x16xf32>
    %c0_75 = arith.constant 0 : index
    %c0_76 = arith.constant 0 : index
    %c5 = arith.constant 5 : index
    %60 = vector.load %arg8[%c0_75, %c0_76, %c5] : memref<2x16x30xf32, #tpu.memory_space<vmem>>, vector<2x16x16xf32>
    %61 = arith.addf %59, %60 : vector<2x16x16xf32>
    %62 = arith.addf %61, %14 : vector<2x16x16xf32>
    %63 = arith.mulf %62, %62 : vector<2x16x16xf32>
    %cst_77 = arith.constant dense<0.000000e+00> : vector<16x16xf32>
    %64 = vector.multi_reduction <add>, %63, %cst_77 [0] : vector<2x16x16xf32> to vector<16x16xf32>
    %c0_78 = arith.constant 0 : index
    %c9_79 = arith.constant 9 : index
    %65 = vector.load %arg9[%c0_78, %c9_79] : memref<16x30xf32, #tpu.memory_space<vmem>>, vector<16x16xf32>
    %c0_80 = arith.constant 0 : index
    %c5_81 = arith.constant 5 : index
    %66 = vector.load %arg10[%c0_80, %c5_81] : memref<16x30xf32, #tpu.memory_space<vmem>>, vector<16x16xf32>
    %67 = arith.addf %65, %66 : vector<16x16xf32>
    %68 = arith.addf %67, %22 : vector<16x16xf32>
    %cst_82 = arith.constant 0.166666672 : f32
    %69 = vector.broadcast %cst_82 : f32 to vector<16x16xf32>
    %70 = arith.mulf %68, %69 : vector<16x16xf32>
    %cst_83 = arith.constant 0.055555556 : f32
    %71 = vector.broadcast %cst_83 : f32 to vector<16x16xf32>
    %72 = arith.mulf %64, %71 : vector<16x16xf32>
    %73 = arith.subf %70, %72 : vector<16x16xf32>
    %c0_84 = arith.constant 0 : index
    %c0_85 = arith.constant 0 : index
    %c2 = arith.constant 2 : index
    %c0_86 = arith.constant 0 : index
    %c0_87 = arith.constant 0 : index
    %74 = vector.load %arg6[%c0_84, %c0_85, %c2, %c0_86, %c0_87] : memref<1x1x8x16x16xf32, #tpu.memory_space<vmem>>, vector<1x1x1x16x16xf32>
    %75 = vector.shape_cast %74 : vector<1x1x1x16x16xf32> to vector<16x16xf32>
    %76 = vector.shape_cast %73 : vector<16x16xf32> to vector<1x1x1x16x16xf32>
    tpu.vector_store %arg6[%c0_84, %c0_85, %c2, %c0_86, %c0_87], %76 {strides = array<i32>} : memref<1x1x8x16x16xf32, #tpu.memory_space<vmem>>, vector<1x1x1x16x16xf32>,
    %c0_88 = arith.constant 0 : index
    %c0_89 = arith.constant 0 : index
    %c10 = arith.constant 10 : index
    %77 = vector.load %arg7[%c0_88, %c0_89, %c10] : memref<2x16x30xf32, #tpu.memory_space<vmem>>, vector<2x16x16xf32>
    %c0_90 = arith.constant 0 : index
    %c0_91 = arith.constant 0 : index
    %c4 = arith.constant 4 : index
    %78 = vector.load %arg8[%c0_90, %c0_91, %c4] : memref<2x16x30xf32, #tpu.memory_space<vmem>>, vector<2x16x16xf32>
    %79 = arith.addf %77, %78 : vector<2x16x16xf32>
    %80 = arith.addf %79, %14 : vector<2x16x16xf32>
    %81 = arith.mulf %80, %80 : vector<2x16x16xf32>
    %cst_92 = arith.constant dense<0.000000e+00> : vector<16x16xf32>
    %82 = vector.multi_reduction <add>, %81, %cst_92 [0] : vector<2x16x16xf32> to vector<16x16xf32>
    %c0_93 = arith.constant 0 : index
    %c10_94 = arith.constant 10 : index
    %83 = vector.load %arg9[%c0_93, %c10_94] : memref<16x30xf32, #tpu.memory_space<vmem>>, vector<16x16xf32>
    %c0_95 = arith.constant 0 : index
    %c4_96 = arith.constant 4 : index
    %84 = vector.load %arg10[%c0_95, %c4_96] : memref<16x30xf32, #tpu.memory_space<vmem>>, vector<16x16xf32>
    %85 = arith.addf %83, %84 : vector<16x16xf32>
    %86 = arith.addf %85, %22 : vector<16x16xf32>
    %cst_97 = arith.constant 0.166666672 : f32
    %87 = vector.broadcast %cst_97 : f32 to vector<16x16xf32>
    %88 = arith.mulf %86, %87 : vector<16x16xf32>
    %cst_98 = arith.constant 0.055555556 : f32
    %89 = vector.broadcast %cst_98 : f32 to vector<16x16xf32>
    %90 = arith.mulf %82, %89 : vector<16x16xf32>
    %91 = arith.subf %88, %90 : vector<16x16xf32>
    %c0_99 = arith.constant 0 : index
    %c0_100 = arith.constant 0 : index
    %c3 = arith.constant 3 : index
    %c0_101 = arith.constant 0 : index
    %c0_102 = arith.constant 0 : index
    %92 = vector.load %arg6[%c0_99, %c0_100, %c3, %c0_101, %c0_102] : memref<1x1x8x16x16xf32, #tpu.memory_space<vmem>>, vector<1x1x1x16x16xf32>
    %93 = vector.shape_cast %92 : vector<1x1x1x16x16xf32> to vector<16x16xf32>
    %94 = vector.shape_cast %91 : vector<16x16xf32> to vector<1x1x1x16x16xf32>
    tpu.vector_store %arg6[%c0_99, %c0_100, %c3, %c0_101, %c0_102], %94 {strides = array<i32>} : memref<1x1x8x16x16xf32, #tpu.memory_space<vmem>>, vector<1x1x1x16x16xf32>,
    %c0_103 = arith.constant 0 : index
    %c0_104 = arith.constant 0 : index
    %c11 = arith.constant 11 : index
    %95 = vector.load %arg7[%c0_103, %c0_104, %c11] : memref<2x16x30xf32, #tpu.memory_space<vmem>>, vector<2x16x16xf32>
    %c0_105 = arith.constant 0 : index
    %c0_106 = arith.constant 0 : index
    %c3_107 = arith.constant 3 : index
    %96 = vector.load %arg8[%c0_105, %c0_106, %c3_107] : memref<2x16x30xf32, #tpu.memory_space<vmem>>, vector<2x16x16xf32>
    %97 = arith.addf %95, %96 : vector<2x16x16xf32>
    %98 = arith.addf %97, %14 : vector<2x16x16xf32>
    %99 = arith.mulf %98, %98 : vector<2x16x16xf32>
    %cst_108 = arith.constant dense<0.000000e+00> : vector<16x16xf32>
    %100 = vector.multi_reduction <add>, %99, %cst_108 [0] : vector<2x16x16xf32> to vector<16x16xf32>
    %c0_109 = arith.constant 0 : index
    %c11_110 = arith.constant 11 : index
    %101 = vector.load %arg9[%c0_109, %c11_110] : memref<16x30xf32, #tpu.memory_space<vmem>>, vector<16x16xf32>
    %c0_111 = arith.constant 0 : index
    %c3_112 = arith.constant 3 : index
    %102 = vector.load %arg10[%c0_111, %c3_112] : memref<16x30xf32, #tpu.memory_space<vmem>>, vector<16x16xf32>
    %103 = arith.addf %101, %102 : vector<16x16xf32>
    %104 = arith.addf %103, %22 : vector<16x16xf32>
    %cst_113 = arith.constant 0.166666672 : f32
    %105 = vector.broadcast %cst_113 : f32 to vector<16x16xf32>
    %106 = arith.mulf %104, %105 : vector<16x16xf32>
    %cst_114 = arith.constant 0.055555556 : f32
    %107 = vector.broadcast %cst_114 : f32 to vector<16x16xf32>
    %108 = arith.mulf %100, %107 : vector<16x16xf32>
    %109 = arith.subf %106, %108 : vector<16x16xf32>
    %c0_115 = arith.constant 0 : index
    %c0_116 = arith.constant 0 : index
    %c4_117 = arith.constant 4 : index
    %c0_118 = arith.constant 0 : index
    %c0_119 = arith.constant 0 : index
    %110 = vector.load %arg6[%c0_115, %c0_116, %c4_117, %c0_118, %c0_119] : memref<1x1x8x16x16xf32, #tpu.memory_space<vmem>>, vector<1x1x1x16x16xf32>
    %111 = vector.shape_cast %110 : vector<1x1x1x16x16xf32> to vector<16x16xf32>
    %112 = vector.shape_cast %109 : vector<16x16xf32> to vector<1x1x1x16x16xf32>
    tpu.vector_store %arg6[%c0_115, %c0_116, %c4_117, %c0_118, %c0_119], %112 {strides = array<i32>} : memref<1x1x8x16x16xf32, #tpu.memory_space<vmem>>, vector<1x1x1x16x16xf32>,
    %c0_120 = arith.constant 0 : index
    %c0_121 = arith.constant 0 : index
    %c12 = arith.constant 12 : index
    %113 = vector.load %arg7[%c0_120, %c0_121, %c12] : memref<2x16x30xf32, #tpu.memory_space<vmem>>, vector<2x16x16xf32>
    %c0_122 = arith.constant 0 : index
    %c0_123 = arith.constant 0 : index
    %c2_124 = arith.constant 2 : index
    %114 = vector.load %arg8[%c0_122, %c0_123, %c2_124] : memref<2x16x30xf32, #tpu.memory_space<vmem>>, vector<2x16x16xf32>
    %115 = arith.addf %113, %114 : vector<2x16x16xf32>
    %116 = arith.addf %115, %14 : vector<2x16x16xf32>
    %117 = arith.mulf %116, %116 : vector<2x16x16xf32>
    %cst_125 = arith.constant dense<0.000000e+00> : vector<16x16xf32>
    %118 = vector.multi_reduction <add>, %117, %cst_125 [0] : vector<2x16x16xf32> to vector<16x16xf32>
    %c0_126 = arith.constant 0 : index
    %c12_127 = arith.constant 12 : index
    %119 = vector.load %arg9[%c0_126, %c12_127] : memref<16x30xf32, #tpu.memory_space<vmem>>, vector<16x16xf32>
    %c0_128 = arith.constant 0 : index
    %c2_129 = arith.constant 2 : index
    %120 = vector.load %arg10[%c0_128, %c2_129] : memref<16x30xf32, #tpu.memory_space<vmem>>, vector<16x16xf32>
    %121 = arith.addf %119, %120 : vector<16x16xf32>
    %122 = arith.addf %121, %22 : vector<16x16xf32>
    %cst_130 = arith.constant 0.166666672 : f32
    %123 = vector.broadcast %cst_130 : f32 to vector<16x16xf32>
    %124 = arith.mulf %122, %123 : vector<16x16xf32>
    %cst_131 = arith.constant 0.055555556 : f32
    %125 = vector.broadcast %cst_131 : f32 to vector<16x16xf32>
    %126 = arith.mulf %118, %125 : vector<16x16xf32>
    %127 = arith.subf %124, %126 : vector<16x16xf32>
    %c0_132 = arith.constant 0 : index
    %c0_133 = arith.constant 0 : index
    %c5_134 = arith.constant 5 : index
    %c0_135 = arith.constant 0 : index
    %c0_136 = arith.constant 0 : index
    %128 = vector.load %arg6[%c0_132, %c0_133, %c5_134, %c0_135, %c0_136] : memref<1x1x8x16x16xf32, #tpu.memory_space<vmem>>, vector<1x1x1x16x16xf32>
    %129 = vector.shape_cast %128 : vector<1x1x1x16x16xf32> to vector<16x16xf32>
    %130 = vector.shape_cast %127 : vector<16x16xf32> to vector<1x1x1x16x16xf32>
    tpu.vector_store %arg6[%c0_132, %c0_133, %c5_134, %c0_135, %c0_136], %130 {strides = array<i32>} : memref<1x1x8x16x16xf32, #tpu.memory_space<vmem>>, vector<1x1x1x16x16xf32>,
    %c0_137 = arith.constant 0 : index
    %c0_138 = arith.constant 0 : index
    %c13 = arith.constant 13 : index
    %131 = vector.load %arg7[%c0_137, %c0_138, %c13] : memref<2x16x30xf32, #tpu.memory_space<vmem>>, vector<2x16x16xf32>
    %c0_139 = arith.constant 0 : index
    %c0_140 = arith.constant 0 : index
    %c1_141 = arith.constant 1 : index
    %132 = vector.load %arg8[%c0_139, %c0_140, %c1_141] : memref<2x16x30xf32, #tpu.memory_space<vmem>>, vector<2x16x16xf32>
    %133 = arith.addf %131, %132 : vector<2x16x16xf32>
    %134 = arith.addf %133, %14 : vector<2x16x16xf32>
    %135 = arith.mulf %134, %134 : vector<2x16x16xf32>
    %cst_142 = arith.constant dense<0.000000e+00> : vector<16x16xf32>
    %136 = vector.multi_reduction <add>, %135, %cst_142 [0] : vector<2x16x16xf32> to vector<16x16xf32>
    %c0_143 = arith.constant 0 : index
    %c13_144 = arith.constant 13 : index
    %137 = vector.load %arg9[%c0_143, %c13_144] : memref<16x30xf32, #tpu.memory_space<vmem>>, vector<16x16xf32>
    %c0_145 = arith.constant 0 : index
    %c1_146 = arith.constant 1 : index
    %138 = vector.load %arg10[%c0_145, %c1_146] : memref<16x30xf32, #tpu.memory_space<vmem>>, vector<16x16xf32>
    %139 = arith.addf %137, %138 : vector<16x16xf32>
    %140 = arith.addf %139, %22 : vector<16x16xf32>
    %cst_147 = arith.constant 0.166666672 : f32
    %141 = vector.broadcast %cst_147 : f32 to vector<16x16xf32>
    %142 = arith.mulf %140, %141 : vector<16x16xf32>
    %cst_148 = arith.constant 0.055555556 : f32
    %143 = vector.broadcast %cst_148 : f32 to vector<16x16xf32>
    %144 = arith.mulf %136, %143 : vector<16x16xf32>
    %145 = arith.subf %142, %144 : vector<16x16xf32>
    %c0_149 = arith.constant 0 : index
    %c0_150 = arith.constant 0 : index
    %c6_151 = arith.constant 6 : index
    %c0_152 = arith.constant 0 : index
    %c0_153 = arith.constant 0 : index
    %146 = vector.load %arg6[%c0_149, %c0_150, %c6_151, %c0_152, %c0_153] : memref<1x1x8x16x16xf32, #tpu.memory_space<vmem>>, vector<1x1x1x16x16xf32>
    %147 = vector.shape_cast %146 : vector<1x1x1x16x16xf32> to vector<16x16xf32>
    %148 = vector.shape_cast %145 : vector<16x16xf32> to vector<1x1x1x16x16xf32>
    tpu.vector_store %arg6[%c0_149, %c0_150, %c6_151, %c0_152, %c0_153], %148 {strides = array<i32>} : memref<1x1x8x16x16xf32, #tpu.memory_space<vmem>>, vector<1x1x1x16x16xf32>,
    %c0_154 = arith.constant 0 : index
    %c0_155 = arith.constant 0 : index
    %c14 = arith.constant 14 : index
    %149 = vector.load %arg7[%c0_154, %c0_155, %c14] : memref<2x16x30xf32, #tpu.memory_space<vmem>>, vector<2x16x16xf32>
    %c0_156 = arith.constant 0 : index
    %c0_157 = arith.constant 0 : index
    %c0_158 = arith.constant 0 : index
    %150 = vector.load %arg8[%c0_156, %c0_157, %c0_158] : memref<2x16x30xf32, #tpu.memory_space<vmem>>, vector<2x16x16xf32>
    %151 = arith.addf %149, %150 : vector<2x16x16xf32>
    %152 = arith.addf %151, %14 : vector<2x16x16xf32>
    %153 = arith.mulf %152, %152 : vector<2x16x16xf32>
    %cst_159 = arith.constant dense<0.000000e+00> : vector<16x16xf32>
    %154 = vector.multi_reduction <add>, %153, %cst_159 [0] : vector<2x16x16xf32> to vector<16x16xf32>
    %c0_160 = arith.constant 0 : index
    %c14_161 = arith.constant 14 : index
    %155 = vector.load %arg9[%c0_160, %c14_161] : memref<16x30xf32, #tpu.memory_space<vmem>>, vector<16x16xf32>
    %c0_162 = arith.constant 0 : index
    %c0_163 = arith.constant 0 : index
    %156 = vector.load %arg10[%c0_162, %c0_163] : memref<16x30xf32, #tpu.memory_space<vmem>>, vector<16x16xf32>
    %157 = arith.addf %155, %156 : vector<16x16xf32>
    %158 = arith.addf %157, %22 : vector<16x16xf32>
    %cst_164 = arith.constant 0.166666672 : f32
    %159 = vector.broadcast %cst_164 : f32 to vector<16x16xf32>
    %160 = arith.mulf %158, %159 : vector<16x16xf32>
    %cst_165 = arith.constant 0.055555556 : f32
    %161 = vector.broadcast %cst_165 : f32 to vector<16x16xf32>
    %162 = arith.mulf %154, %161 : vector<16x16xf32>
    %163 = arith.subf %160, %162 : vector<16x16xf32>
    %c0_166 = arith.constant 0 : index
    %c0_167 = arith.constant 0 : index
    %c7_168 = arith.constant 7 : index
    %c0_169 = arith.constant 0 : index
    %c0_170 = arith.constant 0 : index
    %164 = vector.load %arg6[%c0_166, %c0_167, %c7_168, %c0_169, %c0_170] : memref<1x1x8x16x16xf32, #tpu.memory_space<vmem>>, vector<1x1x1x16x16xf32>
    %165 = vector.shape_cast %164 : vector<1x1x1x16x16xf32> to vector<16x16xf32>
    %166 = vector.shape_cast %163 : vector<16x16xf32> to vector<1x1x1x16x16xf32>
    tpu.vector_store %arg6[%c0_166, %c0_167, %c7_168, %c0_169, %c0_170], %166 {strides = array<i32>} : memref<1x1x8x16x16xf32, #tpu.memory_space<vmem>>, vector<1x1x1x16x16xf32>,
    return
  }
  func.func @transform_0(%arg0: i32, %arg1: i32, %arg2: i32) -> (i32, i32, i32, i32) {
    %c0_i32 = arith.constant 0 : i32
    %c0_i32_0 = arith.constant 0 : i32
    return %arg0, %arg1, %arg2, %c0_i32 : i32, i32, i32, i32
  }
  func.func @transform_1(%arg0: i32, %arg1: i32, %arg2: i32) -> (i32, i32, i32, i32) {
    %c0_i32 = arith.constant 0 : i32
    %c0_i32_0 = arith.constant 0 : i32
    return %arg0, %arg1, %arg2, %c0_i32 : i32, i32, i32, i32
  }
  func.func @transform_2(%arg0: i32, %arg1: i32, %arg2: i32) -> (i32, i32, i32, i32) {
    %c0_i32 = arith.constant 0 : i32
    %c0_i32_0 = arith.constant 0 : i32
    return %arg0, %arg1, %arg2, %c0_i32 : i32, i32, i32, i32
  }
  func.func @transform_3(%arg0: i32, %arg1: i32, %arg2: i32) -> (i32, i32, i32, i32, i32) {
    %c0_i32 = arith.constant 0 : i32
    %c0_i32_0 = arith.constant 0 : i32
    %c0_i32_1 = arith.constant 0 : i32
    return %arg0, %arg1, %c0_i32, %arg2, %c0_i32_0 : i32, i32, i32, i32, i32
  }
}

</mosaic_0001>

<bundles_post_ra>
// kernel: tpu_custom_call.1
= control target key start
LH: loop header
LB: loop body
LE: loop exit
PB: predicated region body
PF: predicated region fallthrough
CT: control target
= control target key end

     0   :  { %s2428_s0 = inlined_call_operand.hbm [shape: f32[2,4,16,16], index: 0, kind: input, shape index: {}]   ;;  %s2429_s1 = inlined_call_operand.hbm [shape: f32[2,4,16,16], index: 1, kind: input, shape index: {}]   ;;  %s2430_s2 = inlined_call_operand.hbm [shape: f32[2,4,16,16], index: 2, kind: input, shape index: {}]   ;;  %s2431_s3 = inlined_call_operand.hbm [shape: f32[2,2,8,16,16], index: 3, kind: output, shape index: {}]  }
   0x1   :  { %2439 = sst [smem:[#allocation21_spill]] %s2428_s0 }
   0x2   :  { %2440 = sst [smem:[#allocation22_spill]] %s2429_s1 }
   0x3   :  { %8 = vsyncpa [#allocation7], 0 }
   0x4   :  { %10 = vsyncpa [#allocation7 + $0x1], 0 }
   0x5   :  { %11 = vsyncpa [#allocation10], 0 }
   0x6   :  { %13 = vsyncpa [#allocation10 + $0x1], 0 }
   0x7   :  { %14 = vsyncpa [#allocation8], 0 }
   0x8   :  { %16 = vsyncpa [#allocation8 + $0x1], 0  ;;  %s1729_s12 = smov 0   ;;  %s1731_s13 = smov 0  }
   0x9   :  { %s1733_s14 = smov 0   ;;  %s1735_s15 = smov 0  }
   0xa   :  { %s1737_s16 = smov 0   ;;  %s1739_s17 = smov 0  }
   0xb   :  { %s1741_s18 = smov 0   ;;  %s1743_s19 = smov 0  }
   0xc LB: > { %2441 = sst [smem:[#allocation16_spill]] %s1672_s17  ;;  %s1770_s20 = sadd.s32 4294967295, %s1680_s19   ;;  %s1680_s19 = sphi %s1743_s19, %s22_s19   ;;  %s1676_s18 = sphi %s1741_s18, %s2460_s18   ;;  %s1672_s17 = sphi %s1739_s17, %s2459_s17   ;;  %s1668_s16 = sphi %s1737_s16, %s2458_s16   ;;  %s1664_s15 = sphi %s1735_s15, %s2457_s15   ;;  %s1660_s14 = sphi %s1733_s14, %s2463_s14   ;;  %s1656_s13 = sphi %s1731_s13, %s2462_s13   ;;  %s1652_s12 = sphi %s1729_s12, %s2461_s12  }
   0xd   : > { %2442 = sst [smem:[#allocation17_spill]] %s1676_s18  ;;  %s1339_s21 = sadd.s32 4294967294, %s1680_s19  }
   0xe   : > { %s37_s22 = sadd.s32 1, %s1672_s17  ;;  %s41_s23 = sadd.s32 1, %s1676_s18 }
   0xf   : > { %p39_p0 = scmp.ge.s32.totalorder %s37_s22, 2  ;;  %s52_s24 = sadd.s32 1, %s1660_s14 }
  0x10   : > { %p59_p1 = scmp.ne.s32.totalorder %s1660_s14, %s1656_s13  ;;  %p60_p2 = scmp.eq.s32.totalorder %s1680_s19, 0 }
  0x11   : > { %s2465_s22 = smov (%p39_p0, %s37_s22), 0  ;;  %s2467_s23 = smov (!%p39_p0, %s41_s23), %s1676_s18 }
  0x12   : > { %2443 = sst [smem:[#allocation18_spill]] %s2465_s22  ;;  %s46_s25 = ssub.s32 %s1672_s17, %s2465_s22 }
  0x13   : > { %p1784_p3 = por %p60_p2, %p59_p1  ;;  %p43_p4 = scmp.ge.s32.totalorder %s2467_s23, 2 }
  0x14   : > { %p65_p5 = scmp.ne.s32.totalorder %s1656_s13, %s1652_s12  ;;  %p66_p6 = scmp.eq.s32.totalorder %s1770_s20, 0 }
  0x15   : > { %p153_p7 = scmp.eq.s32.totalorder %s1770_s20, 3  ;;  %s2469_s23 = smov (%p43_p4, %s2467_s23), 0 }
  0x16   : > { %2445 = sst [smem:[#allocation19_spill]] %s2469_s23  ;;  %p1794_p8 = por %p66_p6, %p65_p5 }
  0x17   : > { %p1798_p9 = por %p153_p7, %p59_p1  ;;  %s45_s29 = ssub.s32 %s1676_s18, %s2469_s23 }
  0x18   : > { %p159_p10 = scmp.eq.s32.totalorder %s1339_s21, 3  ;;  %s47_s30 = sor.u32 %s46_s25, %s45_s29 }
  0x19   : > { %p50_p11 = scmp.eq.s32.totalorder %s47_s30, 0  ;;  %p1407_p13 = scmp.lt.s32.totalorder %s1680_s19, 4 }
  0x1a   : > { %p1804_p12 = por %p159_p10, %p65_p5  ;;  %s2432_s5 = sand.u32 1, %s1660_s14  }
  0x1b   : > { %s1811_s6 = scalar_select %p50_p11, %s1660_s14, %s52_s24  }
  0x1c   : > { %s1815_s7 = sshll.u32 %s2432_s5, 5  ;;  %s1382_s8 = sshll.u32 %s1672_s17, 2 }
  0x1d   : > { %2449 = sst [smem:[#allocation20_spill]] %s1811_s6  ;;  %s1345_s9 = sshll.u32 %s1676_s18, 3 }
  0x1e   : > { %p1821_p0 = pnand %p1407_p13, %p1784_p3  ;;  %s192_s11 = sadd.s32 %s1382_s8, %s1345_s9 }
  0x1f   : > { %s1825_s21 = sshll.u32 %s192_s11, 7  ;;  %s205_s25 = sand.u32 1, %s1680_s19  }
  0x20   : > { %s2451_s1 = sld [smem:[#allocation22_spill]]  ;;  %s209_s5 = scalar_lea.vmem [#allocation9], %s1815_s7 }
  0x21   : > { %s221_s23 = sshll.u32 %s209_s5, 4  ;;  %p1357_p1 = scmp.ge.s32.totalorder %s1680_s19, 1  ;;  %s222_s23 = int_to_ptr.vmem [resolvable:$true] %s221_s23 }
  0x22   : > { %s1834_s26 = scalar_lea.sflag [#allocation10], %s205_s25  ;;  %p1498_p2 = pneg %p1821_p0 }
  0x23   : > { %s1509_s22 = scalar_lea.vmem %s222_s23, 512  ;;  %s1682_s8 = smov [#allocation9]  }
  0x24   : > { %p1510_p3 = scmp.ne.s32.totalorder %s222_s23, %s1509_s22  ;;  %s1514_s9 = sshll.u32 %s1682_s8, 4  ;;  %s1515_s9 = int_to_ptr.vmem [resolvable:$false] %s1514_s9 }
  0x25   : > { %s1516_s11 = scalar_lea.vmem %s1515_s9, 1024  ;;  %p1517_p6 = scmp.lt.s32.totalorder %s222_s23, %s1515_s9 }
  0x26   : > { %s220_s30 = scalar_lea.hbm %s2451_s1, %s1825_s21  ;;  %p1512_p4 = pnand %p1510_p3, %p1498_p2 }
  0x27   : > { %p1518_p7 = scmp.lt.s32.totalorder %s1516_s11, %s1509_s22 }
  0x28   : > { %p1513_p5 = pneg %p1512_p4 }
  0x29   : > { %p1519_p10 = por %p1518_p7, %p1517_p6 }
  0x2b   : > { %p1520_p11 = pnand %p1519_p10, %p1513_p5 }
  0x2d   : > { %1523 = shalt.err (!%p1520_p11)
}
  0x2e   : > { %s2437_s5 = smov 128   ;;  %s1684_s25 = smov 8  }
  0x2f   : > { %1399 = dma.hbm_to_vmem [thread:$0]  (!%p1821_p0), %s220_s30, 512, %s222_s23, %s1834_s26, %s2437_s5, %s2437_s5, %s1684_s25  }
  0x30   : > { %p255_p13 = scmp.lt.s32.totalorder %s1680_s19, 5  ;;  %s2453_s0 = sld [smem:[#allocation21_spill]] }
  0x31   : > { %s183_s9 = scalar_lea.vmem [#allocation6], %s1815_s7  ;;  %s2454_s1 = sand.u32 1, %s1660_s14  }
  0x32   : > { %p1850_p3 = pnand %p1357_p1, %p255_p13  ;;  %s195_s11 = sshll.u32 %s183_s9, 4  ;;  %s196_s11 = int_to_ptr.vmem [resolvable:$true] %s195_s11 }
  0x33   : > { %s180_s18 = scalar_lea.sflag [#allocation7], %s2454_s1  ;;  %s1537_s17 = scalar_lea.vmem %s196_s11, 512 }
  0x34   : > { %p1538_p4 = scmp.ne.s32.totalorder %s196_s11, %s1537_s17  ;;  %s1685_s23 = smov [#allocation6]  }
  0x35   : > { %s1542_s30 = sshll.u32 %s1685_s23, 4  ;;  %s1543_s30 = int_to_ptr.vmem [resolvable:$false] %s1542_s30 }
  0x36   : > { %s194_s8 = scalar_lea.hbm %s2453_s0, %s1825_s21  ;;  %p1540_p5 = pnand %p1538_p4, %p1498_p2 }
  0x37   : > { %s1544_s5 = scalar_lea.vmem %s1543_s30, 1024  ;;  %p1545_p1 = scmp.lt.s32.totalorder %s196_s11, %s1543_s30 }
  0x38   : > { %p1541_p6 = pneg %p1540_p5  ;;  %p1546_p7 = scmp.lt.s32.totalorder %s1544_s5, %s1537_s17 }
  0x3a   : > { %p1547_p10 = por %p1546_p7, %p1545_p1 }
  0x3c   : > { %p1548_p11 = pnand %p1547_p10, %p1541_p6 }
  0x3e   : > { %1551 = shalt.err (!%p1548_p11)
}
  0x3f   : > { %s2455_s24 = smov 128   ;;  %s246_s9 = scalar_lea.hbm %s2430_s2, %s1825_s21 }
  0x40   : > { %1396 = dma.hbm_to_vmem [thread:$0]  (!%p1821_p0), %s194_s8, 512, %s196_s11, %s180_s18, %s2455_s24, %s2455_s24, %s1684_s25  }
  0x41   : > { %s235_s23 = scalar_lea.vmem [#allocation11], %s1815_s7  ;;  %s1686_s5 = smov [#allocation11]  }
  0x42   : > { %s247_s0 = sshll.u32 %s235_s23, 4  ;;  %s1570_s30 = sshll.u32 %s1686_s5, 4  ;;  %s248_s0 = int_to_ptr.vmem [resolvable:$true] %s247_s0  ;;  %s1571_s30 = int_to_ptr.vmem [resolvable:$false] %s1570_s30 }
  0x43   : > { %s1565_s17 = scalar_lea.vmem %s248_s0, 512  ;;  %s1572_s6 = scalar_lea.vmem %s1571_s30, 1024 }
  0x44   : > { %p1566_p13 = scmp.ne.s32.totalorder %s248_s0, %s1565_s17  ;;  %p1573_p6 = scmp.lt.s32.totalorder %s248_s0, %s1571_s30 }
  0x45   : > { %p1574_p1 = scmp.lt.s32.totalorder %s1572_s6, %s1565_s17 }
  0x46   : > { %p1568_p4 = pnand %p1566_p13, %p1498_p2 }
  0x47   : > { %p1575_p7 = por %p1574_p1, %p1573_p6 }
  0x48   : > { %p1569_p5 = pneg %p1568_p4 }
  0x4a   : > { %p1576_p10 = pnand %p1575_p7, %p1569_p5 }
  0x4c   : > { %1579 = shalt.err (!%p1576_p10)
}
  0x4d   : > { %1402 = dma.hbm_to_vmem [thread:$0]  (!%p1821_p0), %s246_s9, 512, %s248_s0, %s1834_s26, %s2455_s24, %s2455_s24, %s1684_s25  }
  0x4e   : > { %259 = sbr.rel (%p1850_p3) target bundleno = 590 (0x24e), region = 32  ;;  %s1886_s18 = sand.u32 (!%p1850_p3), 1, %s1656_s13  }
  0x4f   : > { %s1889_s6 = sshll.u32 (!%p1850_p3), %s1886_s18, 5  ;;  %s262_s7 = scalar_lea.sflag (!%p1850_p3), [#allocation7], %s1886_s18 }
  0x50   : > { %s1893_s21 = scalar_lea.vmem (!%p1850_p3), [#allocation6], %s1889_s6 }
  0x53   : > { %1639 = dma.done.wait (%p1794_p8), %s262_s7, 512  }
  0x54   : > { %1641 = vsyncadd (%p1794_p8), %s262_s7, 4294966784  ;;  %s270_s0 = sand.u32 1, %s1770_s20   ;;  %s274_s26 = scalar_lea.vmem [#allocation9], %s1889_s6 }
  0x55   : > { %s271_s10 = scalar_lea.sflag [#allocation10], %s270_s0 }
  0x56   : > { %1643 = dma.done.wait (%p1794_p8), %s271_s10, 1024  }
  0x57   : > { %1645 = vsyncadd (%p1794_p8), %s271_s10, 4294966272  ;;  %vm323_vm0 = vcmask 56320   ;;  %vm328_vm1 = vcmask 244920   ;;  %v1687_v0 = vmov 0.0   ;;  %v343_v1 = vld [vmem:[%s274_s26 + $0x10] sm:$0xff]  ;;  %v341_v2 = vld [vmem:[%s274_s26] sm:$0xff] }
  0x58   : > { %326 = vst.msk [vmem:[#allocation2 + $0x10] sm:$0xff] %vm323_vm0, %v1687_v0  ;;  %324 = vst.msk [vmem:[#allocation2] sm:$0xff] %vm323_vm0, %v1687_v0  ;;  %s1688_s20 = smov 7   ;;  %v344_v3 = vld [vmem:[%s274_s26 + $0x18] sm:$0xff]  ;;  %v342_v4 = vld [vmem:[%s274_s26 + $0x8] sm:$0xff]  ;;  %s283_s27 = scalar_lea.vmem [#allocation11], %s1889_s6 }
  0x59   : > { %325 = vst.msk [vmem:[#allocation2 + $0x8] sm:$0xff] %vm323_vm0, %v1687_v0  ;;  %327 = vst.msk [vmem:[#allocation2 + $0x18] sm:$0xff] %vm323_vm0, %v1687_v0  ;;  %353 = vrot.lane.b32.xlu1 %v343_v1, %s1688_s20  ;;  %349 = vrot.lane.b32.xlu0 %v341_v2, %s1688_s20  ;;  %v367_v5 = vld [vmem:[%s283_s27 + $0x8] sm:$0xff]  ;;  %v366_v6 = vld [vmem:[%s283_s27] sm:$0xff]  ;;  %vm431_vm2 = vcmask 130048   ;;  %s1689_s25 = smov 8  }
  0x5a   : > { %333 = vst.msk [vmem:[#allocation3] sm:$0xff] %vm323_vm0, %v1687_v0  ;;  %334 = vst.msk [vmem:[#allocation3 + $0x8] sm:$0xff] %vm323_vm0, %v1687_v0  ;;  %v369_v7 = vld [vmem:[%s283_s27 + $0x18] sm:$0xff]  ;;  %v368_v8 = vld [vmem:[%s283_s27 + $0x10] sm:$0xff]  ;;  %s1690_s22 = smov 9   ;;  %s1691_s8 = smov 10  }
  0x5b   : > { %335 = vst.msk [vmem:[#allocation3 + $0x10] sm:$0xff] %vm323_vm0, %v1687_v0  ;;  %336 = vst.msk [vmem:[#allocation3 + $0x18] sm:$0xff] %vm323_vm0, %v1687_v0  ;;  %v1921_v9 = vld [vmem:[%s1893_s21 + $0x8] sm:$0xff]  ;;  %v1924_v10 = vld [vmem:[%s1893_s21] sm:$0xff]  ;;  %s1692_s11 = smov 11   ;;  %s1693_s24 = smov 12  }
  0x5c   : > { %331 = vst.msk [vmem:[#allocation2 + $0x10] sm:$0xff] %vm328_vm1, %v1687_v0  ;;  %329 = vst.msk [vmem:[#allocation2] sm:$0xff] %vm328_vm1, %v1687_v0  ;;  %v1929_v11 = vld [vmem:[%s1893_s21 + $0x18] sm:$0xff]  ;;  %v1932_v12 = vld [vmem:[%s1893_s21 + $0x10] sm:$0xff]  ;;  %v428_v13 = vmul.f32 %v1921_v9, %v1921_v9  ;;  %v427_v15 = vmul.f32 %v1924_v10, %v1924_v10  ;;  %vm361_vm3 = vcmask 187448   ;;  %vm406_vm4 = vcmask 244736  }
  0x5d   : > { %330 = vst.msk [vmem:[#allocation2 + $0x8] sm:$0xff] %vm328_vm1, %v1687_v0  ;;  %332 = vst.msk [vmem:[#allocation2 + $0x18] sm:$0xff] %vm328_vm1, %v1687_v0  ;;  %355 = vrot.lane.b32.xlu1 %v344_v3, %s1688_s20  ;;  %351 = vrot.lane.b32.xlu0 %v342_v4, %s1688_s20  ;;  %v430_v14 = vmul.f32 %v1929_v11, %v1929_v11  ;;  %v429_v16 = vmul.f32 %v1932_v12, %v1932_v12  ;;  %s1694_s1 = smov 2   ;;  %s1695_s29 = smov 4   ;;  %vm748_vm5 = vcmask 212048   ;;  %vm842_vm6 = vcmask 220248  }
  0x5e   : > { %337 = vst.msk [vmem:[#allocation3] sm:$0xff] %vm328_vm1, %v1687_v0  ;;  %338 = vst.msk [vmem:[#allocation3 + $0x8] sm:$0xff] %vm328_vm1, %v1687_v0  ;;  %v435_v17 = vsel %vm431_vm2, %v428_v13, 0.0  ;;  %v432_v19 = vsel %vm431_vm2, %v427_v15, 0.0  ;;  %s1696_s9 = smov 6   ;;  %s1697_s23 = smov 14  }
  0x5f   : > { %339 = vst.msk [vmem:[#allocation3 + $0x10] sm:$0xff] %vm328_vm1, %v1687_v0  ;;  %340 = vst.msk [vmem:[#allocation3 + $0x18] sm:$0xff] %vm328_vm1, %v1687_v0  ;;  %v436_v18 = vsel %vm431_vm2, %v430_v14, 0.0  ;;  %v433_v20 = vsel %vm431_vm2, %v429_v16, 0.0  ;;  %s1698_s17 = smov 13   ;;  %s1699_s5 = smov 121  }
  0x60   : > { %v1954_v21 = vadd.f32 %v436_v18, %v435_v17  ;;  %v1956_v22 = vadd.f32 %v433_v20, %v432_v19  ;;  %vm936_vm7 = vcmask 228448   ;;  %vm560_vm8 = vcmask 195648   ;;  %s1361_s30 = sshll.u32 %s1886_s18, 7  ;;  %s1700_s6 = smov 120  }
  0x61   : > { %376 = vrot.lane.b32.xlu1 %v367_v5, %s1688_s20  ;;  %374 = vrot.lane.b32.xlu0 %v366_v6, %s1688_s20  ;;  %vm1030_vm9 = vcmask 236648   ;;  %vm654_vm10 = vcmask 203848   ;;  %s2296_s7 = scalar_lea.vmem [#allocation12], %s1361_s30  ;;  %s1701_s21 = smov 119   ;;  %vm1124_vm11 = vcmask 244848  }
  0x62   : > { %s1702_s0 = smov 118   ;;  %s1703_s10 = smov 117  }
  0x63   : > { %s1704_s26 = smov 116   ;;  %s1706_s27 = smov 114  }
  0x65   : > { %380 = vrot.lane.b32.xlu1 %v369_v7, %s1688_s20  ;;  %378 = vrot.lane.b32.xlu0 %v368_v8, %s1688_s20 }
  0x69   : > { %456 = vrot.lane.b32.xlu1 %v1921_v9, %s1688_s20  ;;  %454 = vrot.lane.b32.xlu0 %v1924_v10, %s1688_s20 }
  0x6d   : > { %460 = vrot.lane.b32.xlu1 %v1929_v11, %s1688_s20  ;;  %458 = vrot.lane.b32.xlu0 %v1932_v12, %s1688_s20 }
  0x71   : > { %490 = vrot.lane.b32.xlu1 %v1954_v21, %s1688_s20  ;;  %488 = vrot.lane.b32.xlu0 %v1956_v22, %s1688_s20  ;;  %s1705_s20 = smov 115  }
  0x75   : > { %542 = vrot.lane.b32.xlu1 %v1921_v9, %s1689_s25  ;;  %540 = vrot.lane.b32.xlu0 %v1924_v10, %s1689_s25 }
  0x79   : > { %546 = vrot.lane.b32.xlu1 %v1929_v11, %s1689_s25  ;;  %544 = vrot.lane.b32.xlu0 %v1932_v12, %s1689_s25 }
  0x7d   : > { %583 = vrot.lane.b32.xlu1 %v1954_v21, %s1689_s25  ;;  %581 = vrot.lane.b32.xlu0 %v1956_v22, %s1689_s25 }
  0x81   : > { %636 = vrot.lane.b32.xlu1 %v1921_v9, %s1690_s22  ;;  %634 = vrot.lane.b32.xlu0 %v1924_v10, %s1690_s22 }
  0x85   : > { %640 = vrot.lane.b32.xlu1 %v1929_v11, %s1690_s22  ;;  %638 = vrot.lane.b32.xlu0 %v1932_v12, %s1690_s22 }
  0x89   : > { %677 = vrot.lane.b32.xlu1 %v1954_v21, %s1690_s22  ;;  %675 = vrot.lane.b32.xlu0 %v1956_v22, %s1690_s22  ;;  %s1377_s22 = sshll.u32 %s1664_s15, 4 }
  0x8d   : > { %730 = vrot.lane.b32.xlu1 %v1921_v9, %s1691_s8  ;;  %728 = vrot.lane.b32.xlu0 %v1924_v10, %s1691_s8 }
  0x91   : > { %734 = vrot.lane.b32.xlu1 %v1929_v11, %s1691_s8  ;;  %732 = vrot.lane.b32.xlu0 %v1932_v12, %s1691_s8 }
  0x95   : > { %824 = vrot.lane.b32.xlu1 %v1921_v9, %s1692_s11  ;;  %822 = vrot.lane.b32.xlu0 %v1924_v10, %s1692_s11 }
  0x99   : > { %828 = vrot.lane.b32.xlu1 %v1929_v11, %s1692_s11  ;;  %826 = vrot.lane.b32.xlu0 %v1932_v12, %s1692_s11 }
  0x9d   : > { %918 = vrot.lane.b32.xlu1 %v1921_v9, %s1693_s24  ;;  %916 = vrot.lane.b32.xlu0 %v1924_v10, %s1693_s24 }
  0xa1   : > { %922 = vrot.lane.b32.xlu1 %v1929_v11, %s1693_s24  ;;  %920 = vrot.lane.b32.xlu0 %v1932_v12, %s1693_s24 }
  0xcb   : > { %v354_v23 = vpop.permute.xlu1 %353  ;;  %v350_v24 = vpop.permute.xlu0 %349 }
  0xcc   : > { %364 = vst.msk [vmem:[#allocation2 + $0x10] sm:$0xff] %vm361_vm3, %v354_v23  ;;  %362 = vst.msk [vmem:[#allocation2] sm:$0xff] %vm361_vm3, %v350_v24 }
  0xcf   : > { %v356_v25 = vpop.permute.xlu1 %355  ;;  %v352_v26 = vpop.permute.xlu0 %351 }
  0xd0   : > { %365 = vst.msk [vmem:[#allocation2 + $0x18] sm:$0xff] %vm361_vm3, %v356_v25  ;;  %363 = vst.msk [vmem:[#allocation2 + $0x8] sm:$0xff] %vm361_vm3, %v352_v26 }
  0xd3   : > { %v2008_v27 = vld [vmem:[#allocation2 + $0x10] sm:$0xff]  ;;  %v2010_v28 = vld [vmem:[#allocation2] sm:$0xff]  ;;  %v377_v29 = vpop.permute.xlu1 %376  ;;  %v375_v30 = vpop.permute.xlu0 %374 }
  0xd4   : > { %v404_v31 = vmul.f32 %v2008_v27, %v2008_v27  ;;  %v402_v32 = vmul.f32 %v2010_v28, %v2010_v28  ;;  %387 = vst.msk [vmem:[#allocation3 + $0x8] sm:$0xff] %vm361_vm3, %v377_v29  ;;  %386 = vst.msk [vmem:[#allocation3] sm:$0xff] %vm361_vm3, %v375_v30 }
  0xd6   : > { %v408_v33 = vsel %vm406_vm4, %v404_v31, 0.0  ;;  %v407_v34 = vsel %vm406_vm4, %v402_v32, 0.0 }
  0xd7   : > { %v409_v35 = vadd.f32 %v408_v33, %v407_v34  ;;  %v2020_v36 = vld [vmem:[#allocation2 + $0x18] sm:$0xff]  ;;  %v2022_v37 = vld [vmem:[#allocation2 + $0x8] sm:$0xff]  ;;  %v381_v38 = vpop.permute.xlu1 %380  ;;  %v379_v39 = vpop.permute.xlu0 %378 }
  0xd8   : > { %v405_v40 = vmul.f32 %v2020_v36, %v2020_v36  ;;  %v403_v41 = vmul.f32 %v2022_v37, %v2022_v37  ;;  %389 = vst.msk [vmem:[#allocation3 + $0x18] sm:$0xff] %vm361_vm3, %v381_v38  ;;  %388 = vst.msk [vmem:[#allocation3 + $0x10] sm:$0xff] %vm361_vm3, %v379_v39 }
  0xd9   : > { %413 = vst.msk [vmem:[#allocation4] sm:$0xff] %vm406_vm4, %v409_v35 }
  0xda   : > { %v411_v42 = vsel %vm406_vm4, %v405_v40, 0.0  ;;  %v410_v43 = vsel %vm406_vm4, %v403_v41, 0.0 }
  0xdb   : > { %v412_v44 = vadd.f32 %v411_v42, %v410_v43  ;;  %v2033_v45 = vld [vmem:[#allocation3 + $0x8] sm:$0xff]  ;;  %v2035_v46 = vld [vmem:[#allocation3] sm:$0xff]  ;;  %v457_v59 = vpop.permute.xlu1 %456  ;;  %v455_v60 = vpop.permute.xlu0 %454 }
  0xdc   : > { %526 = vrot.lane.b32.xlu1 %v2033_v45, %s1694_s1  ;;  %524 = vrot.lane.b32.xlu0 %v2035_v46, %s1694_s1  ;;  %v416_v47 = vmul.f32 %v2033_v45, %v2033_v45  ;;  %v415_v48 = vmul.f32 %v2035_v46, %v2035_v46  ;;  %v447_v13 = vadd.f32 %v2033_v45, %v2022_v37 }
  0xdd   : > { %414 = vst.msk [vmem:[#allocation4 + $0x8] sm:$0xff] %vm406_vm4, %v412_v44  ;;  %v446_v14 = vadd.f32 %v2035_v46, %v2010_v28 }
  0xde   : > { %v422_v53 = vsel %vm406_vm4, %v416_v47, 0.0  ;;  %v419_v54 = vsel %vm406_vm4, %v415_v48, 0.0  ;;  %v467_v17 = vadd.f32 %v457_v59, %v447_v13 }
  0xdf   : > { %v397_v49 = vld [vmem:[#allocation3 + $0x18] sm:$0xff]  ;;  %v396_v50 = vld [vmem:[#allocation3 + $0x10] sm:$0xff]  ;;  %v461_v61 = vpop.permute.xlu1 %460  ;;  %v459_v62 = vpop.permute.xlu0 %458  ;;  %v466_v18 = vadd.f32 %v455_v60, %v446_v14 }
  0xe0   : > { %v418_v51 = vmul.f32 %v397_v49, %v397_v49  ;;  %v417_v52 = vmul.f32 %v396_v50, %v396_v50  ;;  %530 = vrot.lane.b32.xlu1 %v397_v49, %s1694_s1  ;;  %528 = vrot.lane.b32.xlu0 %v396_v50, %s1694_s1  ;;  %v449_v5 = vadd.f32 %v397_v49, %v2020_v36  ;;  %v2122_v30 = vld [vmem:[#allocation4] sm:$0xff] }
  0xe1   : > { %v448_v6 = vadd.f32 %v396_v50, %v2008_v27  ;;  %v471_v33 = vmul.f32 %v467_v17, %v467_v17  ;;  %v470_v34 = vmul.f32 %v466_v18, %v466_v18 }
  0xe2   : > { %v423_v55 = vsel %vm406_vm4, %v418_v51, 0.0  ;;  %v420_v56 = vsel %vm406_vm4, %v417_v52, 0.0  ;;  %v469_v15 = vadd.f32 %v461_v61, %v449_v5 }
  0xe3   : > { %v424_v57 = vadd.f32 %v423_v55, %v422_v53  ;;  %v421_v58 = vadd.f32 %v420_v56, %v419_v54  ;;  %v491_v63 = vpop.permute.xlu1 %490  ;;  %v489_v0 = vpop.permute.xlu0 %488  ;;  %v468_v16 = vadd.f32 %v459_v62, %v448_v6  ;;  %v477_v43 = vsel %vm361_vm3, %v471_v33, 0.0 }
  0xe4   : > { %620 = vrot.lane.b32.xlu1 %v2033_v45, %s1695_s29  ;;  %618 = vrot.lane.b32.xlu0 %v2035_v46, %s1695_s29  ;;  %v473_v25 = vmul.f32 %v469_v15, %v469_v15  ;;  %v2120_v29 = vld [vmem:[#allocation4 + $0x8] sm:$0xff]  ;;  %v474_v44 = vsel %vm361_vm3, %v470_v34, 0.0 }
  0xe5   : > { %426 = vst.msk [vmem:[#allocation5 + $0x8] sm:$0xff] %vm406_vm4, %v424_v57  ;;  %425 = vst.msk [vmem:[#allocation5] sm:$0xff] %vm406_vm4, %v421_v58  ;;  %v472_v26 = vmul.f32 %v468_v16, %v468_v16 }
  0xe6   : > { %v478_v35 = vsel %vm361_vm3, %v473_v25, 0.0 }
  0xe7   : > { %v2082_v1 = vpop.permute.xlu1 %542  ;;  %v2084_v2 = vpop.permute.xlu0 %540  ;;  %v475_v38 = vsel %vm361_vm3, %v472_v26, 0.0 }
  0xe8   : > { %624 = vrot.lane.b32.xlu1 %v397_v49, %s1695_s29  ;;  %622 = vrot.lane.b32.xlu0 %v396_v50, %s1695_s29 }
  0xeb   : > { %v2092_v3 = vpop.permute.xlu1 %546  ;;  %v2094_v4 = vpop.permute.xlu0 %544 }
  0xec   : > { %714 = vrot.lane.b32.xlu1 %v2033_v45, %s1696_s9  ;;  %712 = vrot.lane.b32.xlu0 %v2035_v46, %s1696_s9  ;;  %v483_v19 = vld [vmem:[#allocation5 + $0x8] sm:$0xff]  ;;  %v482_v20 = vld [vmem:[#allocation5] sm:$0xff] }
  0xed   : > { %v485_v31 = vadd.f32 %v483_v19, %v2120_v29  ;;  %v484_v32 = vadd.f32 %v482_v20, %v2122_v30 }
  0xef   : > { %v2100_v7 = vpop.permute.xlu1 %583  ;;  %v2102_v8 = vpop.permute.xlu0 %581  ;;  %v495_v39 = vadd.f32 %v491_v63, %v485_v31  ;;  %v494_v40 = vadd.f32 %v489_v0, %v484_v32 }
  0xf0   : > { %718 = vrot.lane.b32.xlu1 %v397_v49, %s1696_s9  ;;  %716 = vrot.lane.b32.xlu0 %v396_v50, %s1696_s9 }
  0xf1   : > { %v497_v47 = vmul.f32 0.16666667, %v495_v39  ;;  %v496_v48 = vmul.f32 0.16666667, %v494_v40 }
  0xf3   : > { %v2116_v23 = vpop.permute.xlu1 %636  ;;  %v2118_v24 = vpop.permute.xlu0 %634 }
  0xf4   : > { %806 = vrot.lane.b32.xlu1 %v2035_v46, %s1689_s25  ;;  %808 = vrot.lane.b32.xlu0 %v2033_v45, %s1689_s25 }
  0xf7   : > { %v2130_v41 = vpop.permute.xlu1 %640  ;;  %v2132_v42 = vpop.permute.xlu0 %638 }
  0xf8   : > { %810 = vrot.lane.b32.xlu1 %v396_v50, %s1689_s25  ;;  %812 = vrot.lane.b32.xlu0 %v397_v49, %s1689_s25 }
  0xfb   : > { %v2142_v51 = vpop.permute.xlu1 %677  ;;  %v2144_v52 = vpop.permute.xlu0 %675 }
  0xfc   : > { %900 = vrot.lane.b32.xlu1 %v2035_v46, %s1691_s8  ;;  %902 = vrot.lane.b32.xlu0 %v2033_v45, %s1691_s8 }
  0xff   : > { %v731_v55 = vpop.permute.xlu1 %730  ;;  %v729_v56 = vpop.permute.xlu0 %728 }
 0x100   : > { %904 = vrot.lane.b32.xlu1 %v396_v50, %s1691_s8  ;;  %906 = vrot.lane.b32.xlu0 %v397_v49, %s1691_s8 }
 0x104   : > { %994 = vrot.lane.b32.xlu1 %v2035_v46, %s1693_s24  ;;  %996 = vrot.lane.b32.xlu0 %v2033_v45, %s1693_s24 }
 0x108   : > { %998 = vrot.lane.b32.xlu1 %v396_v50, %s1693_s24  ;;  %1000 = vrot.lane.b32.xlu0 %v397_v49, %s1693_s24 }
 0x10c   : > { %1088 = vrot.lane.b32.xlu1 %v2035_v46, %s1697_s23  ;;  %1090 = vrot.lane.b32.xlu0 %v2033_v45, %s1697_s23  ;;  %v479_v45 = vadd.f32 %v478_v35, %v477_v43  ;;  %v476_v46 = vadd.f32 %v475_v38, %v474_v44 }
 0x110   : > { %1092 = vrot.lane.b32.xlu1 %v396_v50, %s1697_s23  ;;  %1094 = vrot.lane.b32.xlu0 %v397_v49, %s1697_s23  ;;  %v499_v49 = vmul.f32 0.055555556, %v479_v45  ;;  %v498_v50 = vmul.f32 0.055555556, %v476_v46 }
 0x112   : > { %v501_v53 = vsub.f32 %v497_v47, %v499_v49  ;;  %v500_v54 = vsub.f32 %v496_v48, %v498_v50 }
 0x114   : > { %1012 = vrot.lane.b32.xlu1 %v1921_v9, %s1698_s17  ;;  %1010 = vrot.lane.b32.xlu0 %v1924_v10, %s1698_s17 }
 0x118   : > { %1016 = vrot.lane.b32.xlu1 %v1929_v11, %s1698_s17  ;;  %1014 = vrot.lane.b32.xlu0 %v1932_v12, %s1698_s17 }
 0x11c   : > { %575 = vrot.lane.b32.xlu1 %v483_v19, %s1694_s1  ;;  %573 = vrot.lane.b32.xlu0 %v482_v20, %s1694_s1  ;;  %s1188_s1 = sshll.u32 %s2296_s7, 4  ;;  %s2370_s1 = int_to_ptr.vmem [resolvable:$true] %s1188_s1 }
 0x120   : > { %669 = vrot.lane.b32.xlu1 %v483_v19, %s1695_s29  ;;  %667 = vrot.lane.b32.xlu0 %v482_v20, %s1695_s29 }
 0x124   : > { %1106 = vrot.lane.b32.xlu1 %v1921_v9, %s1697_s23  ;;  %1104 = vrot.lane.b32.xlu0 %v1924_v10, %s1697_s23  ;;  %v735_v9 = vpop.permute.xlu1 %734  ;;  %v733_v10 = vpop.permute.xlu0 %732 }
 0x128   : > { %506 = vrot.lane.b32.xlu1 %v501_v53, %s1699_s5  ;;  %504 = vrot.lane.b32.xlu0 %v500_v54, %s1699_s5  ;;  %v825_v57 = vpop.permute.xlu1 %824  ;;  %v823_v58 = vpop.permute.xlu0 %822 }
 0x12c   : > { %1110 = vrot.lane.b32.xlu1 %v1929_v11, %s1697_s23  ;;  %1108 = vrot.lane.b32.xlu0 %v1932_v12, %s1697_s23  ;;  %v2158_v11 = vpop.permute.xlu1 %828  ;;  %v827_v12 = vpop.permute.xlu0 %826 }
 0x130   : > { %763 = vrot.lane.b32.xlu1 %v483_v19, %s1696_s9  ;;  %761 = vrot.lane.b32.xlu0 %v482_v20, %s1696_s9  ;;  %v2162_v59 = vpop.permute.xlu1 %918  ;;  %v2164_v60 = vpop.permute.xlu0 %916  ;;  %s1171_s9 = scalar_lea.sflag [#allocation8], %s1886_s18 }
 0x134   : > { %857 = vrot.lane.b32.xlu1 %v483_v19, %s1689_s25  ;;  %855 = vrot.lane.b32.xlu0 %v482_v20, %s1689_s25  ;;  %v2174_v61 = vpop.permute.xlu1 %922  ;;  %v2176_v62 = vpop.permute.xlu0 %920 }
 0x138   : > { %951 = vrot.lane.b32.xlu1 %v483_v19, %s1691_s8  ;;  %949 = vrot.lane.b32.xlu0 %v482_v20, %s1691_s8 }
 0x13c   : > { %1045 = vrot.lane.b32.xlu1 %v483_v19, %s1693_s24  ;;  %1043 = vrot.lane.b32.xlu0 %v482_v20, %s1693_s24 }
 0x140   : > { %1139 = vrot.lane.b32.xlu1 %v483_v19, %s1697_s23  ;;  %1137 = vrot.lane.b32.xlu0 %v482_v20, %s1697_s23 }
 0x144   : > { %771 = vrot.lane.b32.xlu1 %v1954_v21, %s1691_s8  ;;  %769 = vrot.lane.b32.xlu0 %v1956_v22, %s1691_s8  ;;  %s1378_s8 = sshll.u32 %s1668_s16, 5 }
 0x148   : > { %865 = vrot.lane.b32.xlu1 %v1954_v21, %s1692_s11  ;;  %863 = vrot.lane.b32.xlu0 %v1956_v22, %s1692_s11  ;;  %s1185_s11 = sadd.s32 %s1378_s8, %s1377_s22 }
 0x14c   : > { %959 = vrot.lane.b32.xlu1 %v1954_v21, %s1693_s24  ;;  %957 = vrot.lane.b32.xlu0 %v1956_v22, %s1693_s24  ;;  %s1379_s24 = sshll.u32 %s1185_s11, 7 }
 0x14d   : > { %s2368_s29 = scalar_lea.hbm %s2431_s3, %s1379_s24 }
 0x14e   : > { %v2182_v63 = vpop.permute.xlu1 %526  ;;  %v2184_v0 = vpop.permute.xlu0 %524 }
 0x150   : > { %1053 = vrot.lane.b32.xlu1 %v1954_v21, %s1698_s17  ;;  %1051 = vrot.lane.b32.xlu0 %v1956_v22, %s1698_s17  ;;  %s1707_s17 = smov [#allocation12]  }
 0x151   : > { %s1584_s5 = sshll.u32 %s1707_s17, 4  ;;  %s1585_s5 = int_to_ptr.vmem [resolvable:$false] %s1584_s5 }
 0x152   : > { %v2190_v5 = vpop.permute.xlu1 %530  ;;  %v2192_v6 = vpop.permute.xlu0 %528  ;;  %s1586_s30 = scalar_lea.vmem %s1585_s5, 4096  ;;  %p1587_p3 = scmp.lt.s32.totalorder %s2370_s1, %s1585_s5 }
 0x154   : > { %1147 = vrot.lane.b32.xlu1 %v1954_v21, %s1697_s23  ;;  %1145 = vrot.lane.b32.xlu0 %v1956_v22, %s1697_s23  ;;  %s1580_s23 = scalar_lea.vmem %s2370_s1, 2048 }
 0x155   : > { %p1581_p8 = scmp.ne.s32.totalorder %s2370_s1, %s1580_s23  ;;  %p1588_p11 = scmp.lt.s32.totalorder %s1586_s30, %s1580_s23 }
 0x156   : > { %v2198_v13 = vpop.permute.xlu1 %620  ;;  %v2200_v14 = vpop.permute.xlu0 %618 }
 0x157   : > { %p1582_p0 = pnand %p1581_p8, %p1798_p9  ;;  %p1589_p13 = por %p1588_p11, %p1587_p3 }
 0x159   : > { %p1583_p2 = pneg %p1582_p0 }
 0x15a   : > { %v2202_v15 = vpop.permute.xlu1 %624  ;;  %v2204_v16 = vpop.permute.xlu0 %622 }
 0x15b   : > { %p1590_p4 = pnand %p1589_p13, %p1583_p2 }
 0x15e   : > { %v715_v17 = vpop.permute.xlu1 %714  ;;  %v713_v18 = vpop.permute.xlu0 %712 }
 0x15f   : > { %v725_v19 = vadd.f32 %v715_v17, %v2022_v37  ;;  %v724_v20 = vadd.f32 %v713_v18, %v2010_v28 }
 0x161   : > { %v741_v25 = vadd.f32 %v731_v55, %v725_v19  ;;  %v740_v26 = vadd.f32 %v729_v56, %v724_v20 }
 0x162   : > { %v719_v21 = vpop.permute.xlu1 %718  ;;  %v717_v31 = vpop.permute.xlu0 %716 }
 0x163   : > { %v727_v22 = vadd.f32 %v719_v21, %v2020_v36  ;;  %v726_v32 = vadd.f32 %v717_v31, %v2008_v27  ;;  %v745_v33 = vmul.f32 %v741_v25, %v741_v25  ;;  %v744_v34 = vmul.f32 %v740_v26, %v740_v26 }
 0x165   : > { %v743_v35 = vadd.f32 %v735_v9, %v727_v22  ;;  %v742_v38 = vadd.f32 %v733_v10, %v726_v32  ;;  %v752_v47 = vsel %vm748_vm5, %v745_v33, 0.0  ;;  %v749_v48 = vsel %vm748_vm5, %v744_v34, 0.0 }
 0x166   : > { %v807_v39 = vpop.permute.xlu1 %806  ;;  %v809_v40 = vpop.permute.xlu0 %808 }
 0x167   : > { %v747_v43 = vmul.f32 %v743_v35, %v743_v35  ;;  %v746_v44 = vmul.f32 %v742_v38, %v742_v38  ;;  %v818_v45 = vadd.f32 %v807_v39, %v2010_v28  ;;  %v819_v46 = vadd.f32 %v809_v40, %v2022_v37 }
 0x169   : > { %v753_v49 = vsel %vm748_vm5, %v747_v43, 0.0  ;;  %v750_v50 = vsel %vm748_vm5, %v746_v44, 0.0  ;;  %v834_v53 = vadd.f32 %v823_v58, %v818_v45  ;;  %v835_v54 = vadd.f32 %v825_v57, %v819_v46 }
 0x16a   : > { %v811_v55 = vpop.permute.xlu1 %810  ;;  %v813_v56 = vpop.permute.xlu0 %812  ;;  %v2212_v17 = vadd.f32 %v753_v49, %v752_v47  ;;  %v2214_v9 = vadd.f32 %v750_v50, %v749_v48 }
 0x16b   : > { %v820_v10 = vadd.f32 %v811_v55, %v2008_v27  ;;  %v821_v18 = vadd.f32 %v813_v56, %v2020_v36  ;;  %v838_v19 = vmul.f32 %v834_v53, %v834_v53  ;;  %v839_v20 = vmul.f32 %v835_v54, %v835_v54 }
 0x16d   : > { %v836_v25 = vadd.f32 %v827_v12, %v820_v10  ;;  %v837_v26 = vadd.f32 %v2158_v11, %v821_v18  ;;  %v843_v33 = vsel %vm842_vm6, %v838_v19, 0.0  ;;  %v846_v34 = vsel %vm842_vm6, %v839_v20, 0.0 }
 0x16e   : > { %v901_v21 = vpop.permute.xlu1 %900  ;;  %v903_v31 = vpop.permute.xlu0 %902 }
 0x16f   : > { %v840_v58 = vmul.f32 %v836_v25, %v836_v25  ;;  %v841_v57 = vmul.f32 %v837_v26, %v837_v26  ;;  %v912_v22 = vadd.f32 %v901_v21, %v2010_v28  ;;  %v913_v32 = vadd.f32 %v903_v31, %v2022_v37 }
 0x171   : > { %v844_v35 = vsel %vm842_vm6, %v840_v58, 0.0  ;;  %v847_v38 = vsel %vm842_vm6, %v841_v57, 0.0  ;;  %v928_v39 = vadd.f32 %v2164_v60, %v912_v22  ;;  %v929_v40 = vadd.f32 %v2162_v59, %v913_v32 }
 0x172   : > { %v905_v43 = vpop.permute.xlu1 %904  ;;  %v907_v12 = vpop.permute.xlu0 %906  ;;  %v2223_v44 = vadd.f32 %v847_v38, %v846_v34  ;;  %v2225_v11 = vadd.f32 %v844_v35, %v843_v33  ;;  %v537_v58 = vadd.f32 %v2182_v63, %v2022_v37  ;;  %v536_v57 = vadd.f32 %v2184_v0, %v2010_v28 }
 0x173   : > { %v914_v45 = vadd.f32 %v905_v43, %v2008_v27  ;;  %v915_v46 = vadd.f32 %v907_v12, %v2020_v36  ;;  %v932_v47 = vmul.f32 %v928_v39, %v928_v39  ;;  %v933_v48 = vmul.f32 %v929_v40, %v929_v40 }
 0x174   : > { %v553_v35 = vadd.f32 %v2082_v1, %v537_v58  ;;  %v552_v63 = vadd.f32 %v2084_v2, %v536_v57 }
 0x175   : > { %v930_v49 = vadd.f32 %v2176_v62, %v914_v45  ;;  %v931_v50 = vadd.f32 %v2174_v61, %v915_v46  ;;  %v937_v55 = vsel %vm936_vm7, %v932_v47, 0.0  ;;  %v940_v56 = vsel %vm936_vm7, %v933_v48, 0.0 }
 0x176   : > { %v995_v60 = vpop.permute.xlu1 %994  ;;  %v997_v53 = vpop.permute.xlu0 %996  ;;  %v539_v62 = vadd.f32 %v2190_v5, %v2020_v36  ;;  %v538_v61 = vadd.f32 %v2192_v6, %v2008_v27  ;;  %v633_v5 = vadd.f32 %v2202_v15, %v2020_v36  ;;  %v632_v6 = vadd.f32 %v2204_v16, %v2008_v27 }
 0x177   : > { %v934_v59 = vmul.f32 %v930_v49, %v930_v49  ;;  %v935_v54 = vmul.f32 %v931_v50, %v931_v50  ;;  %v1006_v15 = vadd.f32 %v995_v60, %v2010_v28  ;;  %v1007_v16 = vadd.f32 %v997_v53, %v2022_v37 }
 0x178   : > { %v555_v22 = vadd.f32 %v2092_v3, %v539_v62  ;;  %v554_v32 = vadd.f32 %v2094_v4, %v538_v61  ;;  %v631_v3 = vadd.f32 %v2198_v13, %v2022_v37  ;;  %v630_v4 = vadd.f32 %v2200_v14, %v2010_v28 }
 0x179   : > { %v938_v10 = vsel %vm936_vm7, %v934_v59, 0.0  ;;  %v941_v18 = vsel %vm936_vm7, %v935_v54, 0.0  ;;  %v649_v39 = vadd.f32 %v2130_v41, %v633_v5  ;;  %v648_v40 = vadd.f32 %v2132_v42, %v632_v6 }
 0x17a   : > { %v999_v19 = vpop.permute.xlu1 %998  ;;  %v1001_v20 = vpop.permute.xlu0 %1000  ;;  %v2231_v25 = vadd.f32 %v941_v18, %v940_v56  ;;  %v2233_v26 = vadd.f32 %v938_v10, %v937_v55  ;;  %v559_v38 = vmul.f32 %v555_v22, %v555_v22  ;;  %v558_v0 = vmul.f32 %v554_v32, %v554_v32 }
 0x17b   : > { %v557_v2 = vmul.f32 %v553_v35, %v553_v35  ;;  %v556_v12 = vmul.f32 %v552_v63, %v552_v63  ;;  %v647_v14 = vadd.f32 %v2116_v23, %v631_v3  ;;  %v646_v48 = vadd.f32 %v2118_v24, %v630_v4 }
 0x17c   : > { %v565_v13 = vsel %vm560_vm8, %v559_v38, 0.0  ;;  %v562_v47 = vsel %vm560_vm8, %v558_v0, 0.0  ;;  %v1008_v49 = vadd.f32 %v999_v19, %v2008_v27  ;;  %v1009_v41 = vadd.f32 %v1001_v20, %v2020_v36 }
 0x17d   : > { %v653_v42 = vmul.f32 %v649_v39, %v649_v39  ;;  %v652_v50 = vmul.f32 %v648_v40, %v648_v40  ;;  %v564_v55 = vsel %vm560_vm8, %v557_v2, 0.0  ;;  %v561_v56 = vsel %vm560_vm8, %v556_v12, 0.0 }
 0x17e   : > { %v2239_v21 = vpop.permute.xlu1 %1088  ;;  %v2241_v31 = vpop.permute.xlu0 %1090  ;;  %v566_v62 = vadd.f32 %v565_v13, %v564_v55  ;;  %v563_v23 = vadd.f32 %v562_v47, %v561_v56  ;;  %v651_v24 = vmul.f32 %v647_v14, %v647_v14  ;;  %v650_v61 = vmul.f32 %v646_v48, %v646_v48 }
 0x17f   : > { %v659_v20 = vsel %vm654_vm10, %v653_v42, 0.0  ;;  %v656_v57 = vsel %vm654_vm10, %v652_v50, 0.0 }
 0x182   : > { %v2253_v33 = vpop.permute.xlu1 %1092  ;;  %v2255_v34 = vpop.permute.xlu0 %1094 }
 0x186   : > { %v1013_v1 = vpop.permute.xlu1 %1012  ;;  %v1011_v43 = vpop.permute.xlu0 %1010 }
 0x187   : > { %v1023_v45 = vadd.f32 %v1013_v1, %v1007_v16  ;;  %v1022_v46 = vadd.f32 %v1011_v43, %v1006_v15  ;;  %v658_v15 = vsel %vm654_vm10, %v651_v24, 0.0  ;;  %v655_v16 = vsel %vm654_vm10, %v650_v61, 0.0 }
 0x188   : > { %v592_v1 = vmul.f32 0.055555556, %v566_v62  ;;  %v591_v43 = vmul.f32 0.055555556, %v563_v23  ;;  %v660_v2 = vadd.f32 %v659_v20, %v658_v15  ;;  %v657_v12 = vadd.f32 %v656_v57, %v655_v16 }
 0x189   : > { %v1027_v60 = vmul.f32 %v1023_v45, %v1023_v45  ;;  %v1026_v53 = vmul.f32 %v1022_v46, %v1022_v46  ;;  %v780_v15 = vmul.f32 0.055555556, %v2212_v17 }
 0x18a   : > { %v1017_v59 = vpop.permute.xlu1 %1016  ;;  %v1015_v54 = vpop.permute.xlu0 %1014 }
 0x18b   : > { %v1025_v10 = vadd.f32 %v1017_v59, %v1009_v41  ;;  %v1024_v18 = vadd.f32 %v1015_v54, %v1008_v49  ;;  %v1034_v22 = vsel %vm1030_vm9, %v1027_v60, 0.0  ;;  %v1031_v32 = vsel %vm1030_vm9, %v1026_v53, 0.0 }
 0x18c   : > { %v685_v53 = vmul.f32 0.055555556, %v657_v12 }
 0x18d   : > { %v1029_v19 = vmul.f32 %v1025_v10, %v1025_v10  ;;  %v1028_v58 = vmul.f32 %v1024_v18, %v1024_v18 }
 0x18e   : > { %v576_v5 = vpop.permute.xlu1 %575  ;;  %v574_v6 = vpop.permute.xlu0 %573 }
 0x18f   : > { %v1035_v35 = vsel %vm1030_vm9, %v1029_v19, 0.0  ;;  %v1032_v63 = vsel %vm1030_vm9, %v1028_v58, 0.0  ;;  %v580_v38 = vadd.f32 %v576_v5, %v2120_v29  ;;  %v579_v0 = vadd.f32 %v574_v6, %v2122_v30 }
 0x190   : > { %v2283_v3 = vadd.f32 %v1035_v35, %v1034_v22  ;;  %v2285_v4 = vadd.f32 %v1032_v63, %v1031_v32  ;;  %v1102_v35 = vadd.f32 %v2253_v33, %v2008_v27  ;;  %v1103_v63 = vadd.f32 %v2255_v34, %v2020_v36 }
 0x191   : > { %v588_v39 = vadd.f32 %v2100_v7, %v580_v38  ;;  %v587_v40 = vadd.f32 %v2102_v8, %v579_v0  ;;  %v686_v8 = vmul.f32 0.055555556, %v660_v2 }
 0x192   : > { %v670_v45 = vpop.permute.xlu1 %669  ;;  %v668_v46 = vpop.permute.xlu0 %667 }
 0x193   : > { %v590_v13 = vmul.f32 0.16666667, %v588_v39  ;;  %v589_v47 = vmul.f32 0.16666667, %v587_v40  ;;  %v674_v14 = vadd.f32 %v670_v45, %v2120_v29  ;;  %v673_v48 = vadd.f32 %v668_v46, %v2122_v30 }
 0x194   : > { %v779_v39 = vmul.f32 0.055555556, %v2214_v9 }
 0x195   : > { %v594_v49 = vsub.f32 %v590_v13, %v592_v1  ;;  %v593_v41 = vsub.f32 %v589_v47, %v591_v43  ;;  %v682_v42 = vadd.f32 %v2142_v51, %v674_v14  ;;  %v681_v7 = vadd.f32 %v2144_v52, %v673_v48 }
 0x196   : > { %v1107_v50 = vpop.permute.xlu1 %1106  ;;  %v1105_v60 = vpop.permute.xlu0 %1104  ;;  %v1100_v1 = vadd.f32 %v2239_v21, %v2010_v28  ;;  %v1101_v43 = vadd.f32 %v2241_v31, %v2022_v37  ;;  %v874_v37 = vmul.f32 0.055555556, %v2223_v44  ;;  %v873_v31 = vmul.f32 0.055555556, %v2225_v11 }
 0x197   : > { %v684_v59 = vmul.f32 0.16666667, %v682_v42  ;;  %v683_v54 = vmul.f32 0.16666667, %v681_v7  ;;  %599 = vrot.lane.b32.xlu1 %v594_v49, %s1700_s6  ;;  %597 = vrot.lane.b32.xlu0 %v593_v41, %s1700_s6 }
 0x198   : > { %v1117_v45 = vadd.f32 %v1107_v50, %v1101_v43  ;;  %v1116_v17 = vadd.f32 %v1105_v60, %v1100_v1 }
 0x199   : > { %v688_v55 = vsub.f32 %v684_v59, %v686_v8  ;;  %v687_v56 = vsub.f32 %v683_v54, %v685_v53 }
 0x19a   : > { %v507_v10 = vpop.permute.xlu1 %506  ;;  %v505_v18 = vpop.permute.xlu0 %504  ;;  %v1121_v8 = vmul.f32 %v1117_v45, %v1117_v45  ;;  %v1120_v50 = vmul.f32 %v1116_v17, %v1116_v17 }
 0x19b   : > { %511 = vst.msk [vmem:[%s2296_s7 + $0x8] sm:$0xff] %vm431_vm2, %v507_v10  ;;  %510 = vst.msk [vmem:[%s2296_s7] sm:$0xff] %vm431_vm2, %v505_v18  ;;  %693 = vrot.lane.b32.xlu1 %v688_v55, %s1701_s21  ;;  %691 = vrot.lane.b32.xlu0 %v687_v56, %s1701_s21  ;;  %v968_v10 = vmul.f32 0.055555556, %v2231_v25  ;;  %v967_v18 = vmul.f32 0.055555556, %v2233_v26 }
 0x19c   : > { %v1062_v26 = vmul.f32 0.055555556, %v2283_v3 }
 0x19e   : > { %v1111_v51 = vpop.permute.xlu1 %1110  ;;  %v1109_v52 = vpop.permute.xlu0 %1108 }
 0x19f   : > { %v1119_v2 = vadd.f32 %v1111_v51, %v1103_v63  ;;  %v1118_v12 = vadd.f32 %v1109_v52, %v1102_v35 }
 0x1a1   : > { %v1123_v28 = vmul.f32 %v1119_v2, %v1119_v2  ;;  %v1122_v21 = vmul.f32 %v1118_v12, %v1118_v12 }
 0x1a2   : > { %v764_v62 = vpop.permute.xlu1 %763  ;;  %v762_v23 = vpop.permute.xlu0 %761 }
 0x1a3   : > { %v768_v5 = vadd.f32 %v764_v62, %v2120_v29  ;;  %v767_v6 = vadd.f32 %v762_v23, %v2122_v30  ;;  %v1129_v11 = vsel %vm1124_vm11, %v1123_v28, 0.0  ;;  %v1126_v56 = vsel %vm1124_vm11, %v1122_v21, 0.0 }
 0x1a6   : > { %v858_v24 = vpop.permute.xlu1 %857  ;;  %v856_v61 = vpop.permute.xlu0 %855 }
 0x1a7   : > { %v862_v27 = vadd.f32 %v858_v24, %v2120_v29  ;;  %v861_v36 = vadd.f32 %v856_v61, %v2122_v30  ;;  %v1128_v24 = vsel %vm1124_vm11, %v1121_v8, 0.0  ;;  %v1125_v61 = vsel %vm1124_vm11, %v1120_v50, 0.0 }
 0x1a8   : > { %v1127_v63 = vadd.f32 %v1126_v56, %v1125_v61 }
 0x1aa   : > { %v952_v19 = vpop.permute.xlu1 %951  ;;  %v950_v58 = vpop.permute.xlu0 %949  ;;  %v1155_v12 = vmul.f32 0.055555556, %v1127_v63 }
 0x1ab   : > { %v956_v49 = vadd.f32 %v952_v19, %v2120_v29  ;;  %v955_v41 = vadd.f32 %v950_v58, %v2122_v30 }
 0x1ae   : > { %v1046_v20 = vpop.permute.xlu1 %1045  ;;  %v1044_v57 = vpop.permute.xlu0 %1043 }
 0x1af   : > { %v1050_v51 = vadd.f32 %v1046_v20, %v2120_v29  ;;  %v1049_v52 = vadd.f32 %v1044_v57, %v2122_v30  ;;  %v1061_v20 = vmul.f32 0.055555556, %v2285_v4  ;;  %v1130_v57 = vadd.f32 %v1129_v11, %v1128_v24 }
 0x1b1   : > { %v1156_v2 = vmul.f32 0.055555556, %v1130_v57 }
 0x1b2   : > { %v2302_v22 = vpop.permute.xlu1 %1139  ;;  %v2304_v32 = vpop.permute.xlu0 %1137 }
 0x1b6   : > { %v772_v38 = vpop.permute.xlu1 %771  ;;  %v770_v0 = vpop.permute.xlu0 %769 }
 0x1b7   : > { %v776_v16 = vadd.f32 %v772_v38, %v768_v5  ;;  %v775_v40 = vadd.f32 %v770_v0, %v767_v6  ;;  %v1144_v38 = vadd.f32 %v2302_v22, %v2120_v29  ;;  %v1143_v0 = vadd.f32 %v2304_v32, %v2122_v30 }
 0x1b9   : > { %v778_v33 = vmul.f32 0.16666667, %v776_v16  ;;  %v777_v34 = vmul.f32 0.16666667, %v775_v40 }
 0x1ba   : > { %v866_v46 = vpop.permute.xlu1 %865  ;;  %v864_v13 = vpop.permute.xlu0 %863 }
 0x1bb   : > { %v782_v9 = vsub.f32 %v778_v33, %v780_v15  ;;  %v781_v47 = vsub.f32 %v777_v34, %v779_v39  ;;  %v870_v14 = vadd.f32 %v866_v46, %v862_v27  ;;  %v869_v48 = vadd.f32 %v864_v13, %v861_v36 }
 0x1bd   : > { %v872_v42 = vmul.f32 0.16666667, %v870_v14  ;;  %v871_v7 = vmul.f32 0.16666667, %v869_v48  ;;  %787 = vrot.lane.b32.xlu1 %v782_v9, %s1702_s0  ;;  %785 = vrot.lane.b32.xlu0 %v781_v47, %s1702_s0 }
 0x1be   : > { %v960_v60 = vpop.permute.xlu1 %959  ;;  %v958_v53 = vpop.permute.xlu0 %957 }
 0x1bf   : > { %v876_v59 = vsub.f32 %v872_v42, %v874_v37  ;;  %v875_v54 = vsub.f32 %v871_v7, %v873_v31  ;;  %v964_v55 = vadd.f32 %v960_v60, %v956_v49  ;;  %v963_v44 = vadd.f32 %v958_v53, %v955_v41 }
 0x1c1   : > { %v966_v62 = vmul.f32 0.16666667, %v964_v55  ;;  %v965_v23 = vmul.f32 0.16666667, %v963_v44  ;;  %881 = vrot.lane.b32.xlu1 %v876_v59, %s1703_s10  ;;  %879 = vrot.lane.b32.xlu0 %v875_v54, %s1703_s10 }
 0x1c2   : > { %v1054_v19 = vpop.permute.xlu1 %1053  ;;  %v1052_v58 = vpop.permute.xlu0 %1051 }
 0x1c3   : > { %v970_v5 = vsub.f32 %v966_v62, %v968_v10  ;;  %v969_v6 = vsub.f32 %v965_v23, %v967_v18  ;;  %v1058_v25 = vadd.f32 %v1054_v19, %v1050_v51  ;;  %v1057_v35 = vadd.f32 %v1052_v58, %v1049_v52 }
 0x1c5   : > { %v1060_v15 = vmul.f32 0.16666667, %v1058_v25  ;;  %v1059_v16 = vmul.f32 0.16666667, %v1057_v35  ;;  %975 = vrot.lane.b32.xlu1 %v970_v5, %s1704_s26  ;;  %973 = vrot.lane.b32.xlu0 %v969_v6, %s1704_s26 }
 0x1c6   : > { %v1148_v39 = vpop.permute.xlu1 %1147  ;;  %v1146_v40 = vpop.permute.xlu0 %1145 }
 0x1c7   : > { %v1064_v1 = vsub.f32 %v1060_v15, %v1062_v26  ;;  %v1063_v43 = vsub.f32 %v1059_v16, %v1061_v20  ;;  %v1152_v3 = vadd.f32 %v1148_v39, %v1144_v38  ;;  %v1151_v4 = vadd.f32 %v1146_v40, %v1143_v0 }
 0x1c9   : > { %v1154_v27 = vmul.f32 0.16666667, %v1152_v3  ;;  %v1153_v29 = vmul.f32 0.16666667, %v1151_v4  ;;  %1069 = vrot.lane.b32.xlu1 %v1064_v1, %s1705_s20  ;;  %1067 = vrot.lane.b32.xlu0 %v1063_v43, %s1705_s20 }
 0x1cb   : > { %v1158_v30 = vsub.f32 %v1154_v27, %v1156_v2  ;;  %v1157_v22 = vsub.f32 %v1153_v29, %v1155_v12 }
 0x1cd   : > { %1163 = vrot.lane.b32.xlu1 %v1158_v30, %s1706_s27  ;;  %1161 = vrot.lane.b32.xlu0 %v1157_v22, %s1706_s27 }
 0x209   : > { %v600_v32 = vpop.permute.xlu1 %599  ;;  %v598_v36 = vpop.permute.xlu0 %597 }
 0x20a   : > { %1363 = vst.msk [vmem:[%s2296_s7 + $0x18] sm:$0xff] %vm431_vm2, %v600_v32  ;;  %1362 = vst.msk [vmem:[%s2296_s7 + $0x10] sm:$0xff] %vm431_vm2, %v598_v36 }
 0x20d   : > { %v694_v33 = vpop.permute.xlu1 %693  ;;  %v692_v34 = vpop.permute.xlu0 %691 }
 0x20e   : > { %1365 = vst.msk [vmem:[%s2296_s7 + $0x28] sm:$0xff] %vm431_vm2, %v694_v33  ;;  %1364 = vst.msk [vmem:[%s2296_s7 + $0x20] sm:$0xff] %vm431_vm2, %v692_v34 }
 0x22f   : > { %v788_v45 = vpop.permute.xlu1 %787  ;;  %v786_v17 = vpop.permute.xlu0 %785 }
 0x230   : > { %1367 = vst.msk [vmem:[%s2296_s7 + $0x38] sm:$0xff] %vm431_vm2, %v788_v45  ;;  %1366 = vst.msk [vmem:[%s2296_s7 + $0x30] sm:$0xff] %vm431_vm2, %v786_v17 }
 0x233   : > { %v882_v46 = vpop.permute.xlu1 %881  ;;  %v880_v13 = vpop.permute.xlu0 %879 }
 0x234   : > { %1369 = vst.msk [vmem:[%s2296_s7 + $0x48] sm:$0xff] %vm431_vm2, %v882_v46  ;;  %1368 = vst.msk [vmem:[%s2296_s7 + $0x40] sm:$0xff] %vm431_vm2, %v880_v13 }
 0x237   : > { %v976_v9 = vpop.permute.xlu1 %975  ;;  %v974_v47 = vpop.permute.xlu0 %973 }
 0x238   : > { %1371 = vst.msk [vmem:[%s2296_s7 + $0x58] sm:$0xff] %vm431_vm2, %v976_v9  ;;  %1370 = vst.msk [vmem:[%s2296_s7 + $0x50] sm:$0xff] %vm431_vm2, %v974_v47 }
 0x23b   : > { %v1070_v14 = vpop.permute.xlu1 %1069  ;;  %v1068_v48 = vpop.permute.xlu0 %1067 }
 0x23c   : > { %1373 = vst.msk [vmem:[%s2296_s7 + $0x68] sm:$0xff] %vm431_vm2, %v1070_v14  ;;  %1372 = vst.msk [vmem:[%s2296_s7 + $0x60] sm:$0xff] %vm431_vm2, %v1068_v48 }
 0x23f   : > { %v1164_v28 = vpop.permute.xlu1 %1163  ;;  %v1162_v21 = vpop.permute.xlu0 %1161 }
 0x240   : > { %1375 = vst.msk [vmem:[%s2296_s7 + $0x78] sm:$0xff] %vm431_vm2, %v1164_v28  ;;  %1374 = vst.msk [vmem:[%s2296_s7 + $0x70] sm:$0xff] %vm431_vm2, %v1162_v21 }
 0x241   : > { %1593 = shalt.err (!%p1590_p4)
}
 0x242   : > { %s1594_s6 = scalar_lea.hbm %s2368_s29, 2048  ;;  %s1598_s0 = scalar_lea.hbm %s2431_s3, 8192 }
 0x243   : > { %p1595_p5 = scmp.ne.s32.totalorder %s2368_s29, %s1594_s6  ;;  %p1599_p7 = scmp.lt.s32.totalorder %s2368_s29, %s2431_s3 }
 0x244   : > { %p1600_p10 = scmp.lt.s32.totalorder %s1598_s0, %s1594_s6 }
 0x245   : > { %p1596_p6 = pnand %p1595_p5, %p1798_p9 }
 0x246   : > { %p1601_p8 = por %p1600_p10, %p1599_p7 }
 0x247   : > { %p1597_p1 = pneg %p1596_p6 }
 0x249   : > { %p1602_p0 = pnand %p1601_p8, %p1597_p1 }
 0x24b   : > { %1605 = shalt.err (!%p1602_p0)
}
 0x24c   : > { %s1708_s20 = smov 128  }
 0x24d   : > { %1391 = dma.vmem_to_hbm [thread:$0]  (%p1798_p9), %s2370_s1, 2048, %s2368_s29, %s1171_s9, %s1708_s20, %s1708_s20, %s1689_s25  }
 0x24e PF: > { %p1408_p2 = scmp.ge.s32.totalorder %s1680_s19, 2  ;;  %s1203_s27 = sand.u32 1, %s1652_s12  }
 0x24f   : > { %s1204_s22 = scalar_lea.sflag [#allocation8], %s1203_s27 }
 0x250   : > { %p1404_p3 = pnand %p1408_p2, %p1804_p12 }
 0x252   : > { %p1405_p11 = pneg %p1404_p3 }
 0x254   : > { %1647 = dma.done.wait (%p1405_p11), %s1204_s22, 2048  }
 0x255   : > { %1649 = vsyncadd (%p1405_p11), %s1204_s22, 4294965248  ;;  %s22_s19 = sadd.s32 1, %s1680_s19   ;;  %s2456_s28 = sld [smem:[#allocation20_spill]] }
 0x256   : > { %p19_p13 = scmp.ge.s32.totalorder %s22_s19, 6   ;;  %s2457_s15 = sld [smem:[#allocation16_spill]] }
 0x257   : > { %s2458_s16 = sld [smem:[#allocation17_spill]]  ;;  %s2461_s12 = smov %s1656_s13 }
 0x258   : > { %s2459_s17 = sld [smem:[#allocation18_spill]]  ;;  %s2462_s13 = smov %s1660_s14 }
 0x259   : > { %s2460_s18 = sld [smem:[#allocation19_spill]]  ;;  %21 = sbr.rel (!%p19_p13) target bundleno = 12 (0xc), region = 108 }
 0x25b   : > { %s2463_s14 = smov %s2456_s28 }
 0x25e   :  { %1209 = vsyncpa [#allocation7], 1 }
 0x25f   :  { %1211 = vsyncpa [#allocation7 + $0x1], 1 }
 0x260   :  { %1212 = vsyncpa [#allocation10], 1 }
 0x261   :  { %1214 = vsyncpa [#allocation10 + $0x1], 1 }
 0x262   :  { %1215 = vsyncpa [#allocation8], 1 }
 0x263   :  { %1217 = vsyncpa [#allocation8 + $0x1], 1 }

</bundles_post_ra>
